<compile_context>
chip_gen: v6e
topology: v6e:2x2x1
jax: 0.10.0
libtpu: 0.0.40
codegen_flags: <defaults>
</compile_context>

<pallas_src>
import collections
import functools
import math

import jax
import jax.numpy as jnp
from jax.experimental import pallas as pl
from jax.experimental.pallas import tpu as pltpu

SQRT2 = math.sqrt(2.0)


# ------------------------------ small helpers -------------------------------

def _pick_tile(dim, candidates):
    """Largest candidate tile that evenly divides `dim`, else the full dim."""
    for c in candidates:
        if dim >= c and dim % c == 0:
            return c
    return dim


def _vmem_limit(need_bytes):
    """Explicit scoped-VMEM budget: 2x the estimated need, floored at 32 MiB,
    capped at 48 MiB so the same plan also fits v7x's 64 MiB physical VMEM."""
    return int(min(max(2 * need_bytes, 32 * 1024 * 1024), 48 * 1024 * 1024))


# ------------------------------ Pallas kernels -------------------------------

def _gemm_bias_act_kernel(a_ref, b_ref, bias_ref, o_ref, acc_ref, *, act):
    """Tiled GEMM: bf16 operands, f32 accumulation, fused bias (+ leaky-relu)."""
    @pl.when(pl.program_id(2) == 0)
    def _():
        acc_ref[...] = jnp.zeros_like(acc_ref)

    acc_ref[...] += jnp.dot(a_ref[...], b_ref[...],
                            preferred_element_type=jnp.float32)

    @pl.when(pl.program_id(2) == pl.num_programs(2) - 1)
    def _():
        r = acc_ref[...] + bias_ref[...]          # f32 epilogue (v5e-friendly)
        if act:                                   # fused_leaky_relu(0.2)*sqrt(2)
            r = jnp.where(r >= 0.0, r, 0.2 * r) * SQRT2
        o_ref[...] = r.astype(o_ref.dtype)


def pallas_gemm_bias_act(a, b, bias, act, out_dtype=jnp.bfloat16):
    """(M,K)@(K,N) + bias, tiled with K as the last ('arbitrary') grid axis."""
    M, K = a.shape
    K2, N = b.shape
    assert K == K2
    tm = _pick_tile(M, (256, 128, 64, 32, 16, 8))
    tn = _pick_tile(N, (256, 128))
    tk = _pick_tile(K, (512, 256, 128))
    grid = (M // tm, N // tn, K // tk)
    bias2 = bias.reshape(1, N).astype(jnp.float32)
    need = (2 * (tm * tk + tk * tn) * 2 + 2 * tm * max(tn, 128) * 2
            + tm * max(tn, 128) * 4 + 2 * max(tn, 128) * 4)
    cost = pl.CostEstimate(flops=2 * M * N * K, transcendentals=0,
                           bytes_accessed=(M * K + K * N) * 2 + M * N * 2 + N * 4)
    return pl.pallas_call(
        functools.partial(_gemm_bias_act_kernel, act=act),
        out_shape=jax.ShapeDtypeStruct((M, N), out_dtype),
        grid=grid,
        in_specs=[
            pl.BlockSpec((tm, tk), lambda i, j, k: (i, k)),
            pl.BlockSpec((tk, tn), lambda i, j, k: (k, j)),
            pl.BlockSpec((1, tn), lambda i, j, k: (0, j)),
        ],
        out_specs=pl.BlockSpec((tm, tn), lambda i, j, k: (i, j)),
        scratch_shapes=[pltpu.VMEM((tm, tn), jnp.float32)],
        compiler_params=pltpu.CompilerParams(
            dimension_semantics=("parallel", "parallel", "arbitrary"),
            vmem_limit_bytes=_vmem_limit(need)),
        cost_estimate=cost,
    )(a.astype(jnp.bfloat16), b.astype(jnp.bfloat16), bias2)


def _conv_tap_kernel(x_ref, w_ref, b_ref, o_ref, *, k, act):
    """Direct KxK conv on one padded feature map: the k*k shifted taps are
    sliced in VMEM (in-kernel im2col) and accumulated in f32."""
    _, H, W, Cout = o_ref.shape
    Cin = w_ref.shape[1]
    xp = x_ref[0]                                         # (Hp, Wp, Cin) bf16
    acc = jnp.zeros((H * W, Cout), jnp.float32)
    for di in range(k):
        for dj in range(k):
            win = xp[di:di + H, dj:dj + W, :].reshape(H * W, Cin)
            acc = acc + jnp.dot(win, w_ref[di * k + dj],
                                preferred_element_type=jnp.float32)
    acc = acc + b_ref[...]
    if act:
        acc = jnp.where(acc >= 0.0, acc, 0.2 * acc) * SQRT2
    # TODO(synk): pack (H, W*Cout) lane-dense stores when Cout < 128.
    o_ref[0] = acc.reshape(H, W, Cout).astype(o_ref.dtype)


def pallas_conv2d(x, p, act):
    """SAME-padded KxK conv (stride 1), batched over the grid.  No HBM im2col.

    TODO(synk): at large resolutions, tile spatially (overlapping halo rows via
    pl.Element index maps) instead of one whole feature map per block.
    """
    B, H, W, Cin = x.shape
    k = p['k']
    pad = k // 2
    Cout = p['w'].shape[-1]
    xp = jnp.pad(x.astype(jnp.bfloat16),
                 ((0, 0), (pad, pad), (pad, pad), (0, 0)))
    Hp, Wp = H + 2 * pad, W + 2 * pad
    need = ((Hp * Wp * Cin + H * W * Cout) * 2 * 2
            + H * W * max(Cout, 128) * 4
            + k * k * Cin * max(Cout, 128) * 2)
    cost = pl.CostEstimate(
        flops=2 * B * H * W * k * k * Cin * Cout, transcendentals=0,
        bytes_accessed=B * Hp * Wp * Cin * 2 + k * k * Cin * Cout * 2
                       + B * H * W * Cout * 2)
    return pl.pallas_call(
        functools.partial(_conv_tap_kernel, k=k, act=act),
        out_shape=jax.ShapeDtypeStruct((B, H, W, Cout), jnp.bfloat16),
        grid=(B,),
        in_specs=[
            pl.BlockSpec((1, Hp, Wp, Cin), lambda b: (b, 0, 0, 0)),
            pl.BlockSpec((k * k, Cin, Cout), lambda b: (0, 0, 0)),
            pl.BlockSpec((1, Cout), lambda b: (0, 0)),
        ],
        out_specs=pl.BlockSpec((1, H, W, Cout), lambda b: (b, 0, 0, 0)),
        compiler_params=pltpu.CompilerParams(
            dimension_semantics=("parallel",),
            vmem_limit_bytes=_vmem_limit(need)),
        cost_estimate=cost,
    )(xp, p['w'], p['b'].reshape(1, -1).astype(jnp.float32))


def _extraction_kernel(k_ref, v_ref, tex_ref, m_sc, l_sc, acc_sc):
    """Flash-style neural-texture extraction: online softmax over the spatial
    (HW) reduction axis; the (HW,L)->(L,HW) transpose is folded in-kernel."""
    t = pl.program_id(1)

    @pl.when(t == 0)
    def _():
        m_sc[...] = jnp.full(m_sc.shape, -jnp.inf, m_sc.dtype)
        l_sc[...] = jnp.zeros_like(l_sc)
        acc_sc[...] = jnp.zeros_like(acc_sc)

    kt = k_ref[0].astype(jnp.float32).T                   # (L, hw_t)
    m_prev = m_sc[...]                                    # (L, 1)
    m_new = jnp.maximum(m_prev, jnp.max(kt, axis=-1, keepdims=True))
    corr = jnp.exp(m_prev - m_new)                        # (L, 1)
    p = jnp.exp(kt - m_new)                               # (L, hw_t)
    l_sc[...] = corr * l_sc[...] + jnp.sum(p, axis=-1, keepdims=True)
    acc_sc[...] = corr * acc_sc[...] + jnp.dot(
        p.astype(v_ref.dtype), v_ref[0], preferred_element_type=jnp.float32)
    m_sc[...] = m_new

    @pl.when(t == pl.num_programs(1) - 1)
    def _():
        tex_ref[0] = (acc_sc[...] *
                      pl.reciprocal(l_sc[...], approx=True)).astype(tex_ref.dtype)


def _hw_tile(hw):
    for cand in (1024, 512, 256):
        if hw > cand and hw % cand == 0:
            return cand
    return hw


def pallas_extraction(key_logits, value):
    """key_logits: (B, HW, L), value: (B, HW, C) -> neural texture (B, L, C)."""
    B, HW, L = key_logits.shape
    C = value.shape[-1]
    hw_t = _hw_tile(HW)
    need = 2 * hw_t * (L + C) * 2 + 2 * L * max(C, 128) * 4 + L * 128 * 8
    return pl.pallas_call(
        _extraction_kernel,
        out_shape=jax.ShapeDtypeStruct((B, L, C), jnp.bfloat16),
        grid=(B, HW // hw_t),
        in_specs=[
            pl.BlockSpec((1, hw_t, L), lambda b, t: (b, t, 0)),
            pl.BlockSpec((1, hw_t, C), lambda b, t: (b, t, 0)),
        ],
        out_specs=pl.BlockSpec((1, L, C), lambda b, t: (b, 0, 0)),
        scratch_shapes=[
            pltpu.VMEM((L, 1), jnp.float32),   # running max
            pltpu.VMEM((L, 1), jnp.float32),   # running denom
            pltpu.VMEM((L, C), jnp.float32),   # accumulator
        ],
        compiler_params=pltpu.CompilerParams(
            dimension_semantics=("parallel", "arbitrary"),
            vmem_limit_bytes=_vmem_limit(need)),
    )(key_logits.astype(jnp.bfloat16), value.astype(jnp.bfloat16))


def _distribution_kernel(q_ref, tex_ref, o_ref):
    """Distribution attention: softmax over labels (L), then @ texture."""
    q = q_ref[0].astype(jnp.float32)                      # (hw_t, L)
    m = jnp.max(q, axis=-1, keepdims=True)
    e = jnp.exp(q - m)
    attn = e * pl.reciprocal(jnp.sum(e, axis=-1, keepdims=True), approx=True)
    o_ref[0] = jnp.dot(attn.astype(tex_ref.dtype), tex_ref[0],
                       preferred_element_type=jnp.float32).astype(o_ref.dtype)


def pallas_distribution(query_logits, texture):
    """query_logits: (B, HW, L), texture: (B, L, C) -> (B, HW, C)."""
    B, HW, L = query_logits.shape
    C = texture.shape[-1]
    hw_t = _hw_tile(HW)
    need = 2 * hw_t * (L + C) * 2 + 2 * L * max(C, 128) * 2
    return pl.pallas_call(
        _distribution_kernel,
        out_shape=jax.ShapeDtypeStruct((B, HW, C), jnp.bfloat16),
        grid=(B, HW // hw_t),
        in_specs=[
            pl.BlockSpec((1, hw_t, L), lambda b, t: (b, t, 0)),
            pl.BlockSpec((1, L, C), lambda b, t: (b, 0, 0)),
        ],
        out_specs=pl.BlockSpec((1, hw_t, C), lambda b, t: (b, t, 0)),
        compiler_params=pltpu.CompilerParams(
            dimension_semantics=("parallel", "parallel"),
            vmem_limit_bytes=_vmem_limit(need)),
    )(query_logits.astype(jnp.bfloat16), texture.astype(jnp.bfloat16))


# -------------------------------- JAX glue ----------------------------------

def conv2d(x, p, stride=1, act=True):
    """SAME KxK conv.  1x1 -> tiled GEMM; k>1 -> direct tap conv kernel."""
    k = p['k']
    if k == 1:
        B, H, W, Cin = x.shape
        out = pallas_gemm_bias_act(x.reshape(B * H * W, Cin), p['w'], p['b'], act)
        out = out.reshape(B, H, W, -1)
    else:
        out = pallas_conv2d(x, p, act)
    if stride > 1:
        # stride-s SAME conv == stride-1 conv + subsample (identical taps).
        # TODO(synk): fuse the subsample into the conv kernel's store.
        out = out[:, ::stride, ::stride, :]
    return out


def upsample2x(x):
    # TODO(synk): fuse nearest-2x upsample into the following conv kernel to
    # avoid materializing the 4x feature map in HBM.
    return jnp.repeat(jnp.repeat(x, 2, axis=1), 2, axis=2)


# ------------------------------- parameters ---------------------------------

def init_conv(key, k, cin, cout):
    w = jax.random.normal(key, (k * k, cin, cout), jnp.float32) / math.sqrt(k * k * cin)
    if k == 1:
        w = w.reshape(cin, cout)
    return {'w': w.astype(jnp.bfloat16),
            'b': jnp.zeros((cout,), jnp.float32),
            'k': k}


def build_generator_params(key, size, semantic_dim, channels, num_labels, match_kernels):
    log_size = int(math.log2(size))
    resolutions = [2 ** i for i in range(log_size, 1, -1)]   # e.g. [16, 8, 4]
    keys = jax.random.split(key, 64)
    ki = iter(range(64))

    params = {}

    # reference encoder (RGB input, records neural textures per level)
    ref = {'from_rgb': init_conv(keys[next(ki)], 3, 3, channels[size]),
           'down': [], 'extract': []}
    prev = channels[size]
    for r in resolutions[1:]:
        cout = channels[r]
        ref['down'].append(init_conv(keys[next(ki)], 3, prev, cout))
        L, mk = num_labels[r], match_kernels[r]
        ref['extract'].append({
            'key': init_conv(keys[next(ki)], mk, cout, L),
            'value': init_conv(keys[next(ki)], 1, cout, cout),
        })
        prev = cout
    params['reference_encoder'] = ref

    # skeleton encoder (semantic_dim input, no extraction)
    ske = {'from_rgb': init_conv(keys[next(ki)], 3, semantic_dim, channels[size]),
           'down': []}
    prev = channels[size]
    for r in resolutions[1:]:
        cout = channels[r]
        ske['down'].append(init_conv(keys[next(ki)], 3, prev, cout))
        prev = cout
    params['skeleton_encoder'] = ske

    # decoder / target image renderer
    dec = {'dist': [], 'up_conv': []}
    up_res = resolutions[::-1]                               # e.g. [4, 8, 16]
    prev = channels[up_res[0]]
    for r in up_res[:-1]:
        L, mk = num_labels[r], match_kernels[r]
        dec['dist'].append({'query': init_conv(keys[next(ki)], mk, prev, L)})
        cout = channels[r * 2]
        dec['up_conv'].append(init_conv(keys[next(ki)], 3, prev, cout))
        prev = cout
    dec['to_rgb'] = init_conv(keys[next(ki)], 3, prev, 3)
    params['decoder'] = dec
    return params, resolutions


# ------------------------------ forward passes -------------------------------

def encoder_forward(params, x, extract=False, recoder=None):
    feat = conv2d(x, params['from_rgb'], stride=1, act=True)
    for i, cp in enumerate(params['down']):
        feat = conv2d(feat, cp, stride=2, act=True)
        if extract:
            ep = params['extract'][i]
            key_map = conv2d(feat, ep['key'], stride=1, act=False)    # (B,H,W,L)
            val_map = conv2d(feat, ep['value'], stride=1, act=False)  # (B,H,W,C)
            B, H, W, L = key_map.shape
            C = val_map.shape[-1]
            key_logits = key_map.reshape(B, H * W, L)   # natural layout, no transpose
            value = val_map.reshape(B, H * W, C)
            tex = pallas_extraction(key_logits, value)  # (B, L, C)
            recoder['encoder_output'].append(tex)
            recoder['extraction_softmax_logits'].append(key_logits)
    return feat


def decoder_forward(params, feat, neural_textures, recoder, source_image):
    # TODO(synk): original Decoder also receives source_image; unused here.
    n = len(neural_textures)
    for i, (dp, up) in enumerate(zip(params['dist'], params['up_conv'])):
        tex = neural_textures[n - 1 - i]                        # deepest first
        q_map = conv2d(feat, dp['query'], stride=1, act=False)  # (B,H,W,L)
        B, H, W, L = q_map.shape
        q = q_map.reshape(B, H * W, L)
        dist = pallas_distribution(q, tex)                      # (B,HW,C)
        feat = feat + dist.reshape(B, H, W, -1)
        recoder['decoder_attention_logits'].append(q)
        feat = conv2d(feat, up, stride=1, act=True)
        feat = upsample2x(feat)
    return conv2d(feat, params['to_rgb'], stride=1, act=False)


def generator_forward(params, source_image, skeleton):
    """source_image: (B,3,H,W) NCHW, skeleton: (B,semantic_dim,H,W) NCHW."""
    output_dict = {}
    recoder = collections.defaultdict(list)
    src = jnp.transpose(source_image, (0, 2, 3, 1)).astype(jnp.bfloat16)   # NHWC
    skel = jnp.transpose(skeleton, (0, 2, 3, 1)).astype(jnp.bfloat16)      # NHWC

    skeleton_feature = encoder_forward(params['skeleton_encoder'], skel)
    _ = encoder_forward(params['reference_encoder'], src,
                        extract=True, recoder=recoder)
    neural_textures = recoder['encoder_output']
    fake = decoder_forward(params['decoder'], skeleton_feature,
                           neural_textures, recoder, src)
    output_dict['fake_image'] = jnp.transpose(fake, (0, 3, 1, 2)).astype(jnp.float32)
    output_dict['info'] = dict(recoder)
    return output_dict


# ----------------------------------- main ------------------------------------

if __name__ == "__main__":
    size = 16
    semantic_dim = 4
    channels = {16: 32, 8: 32, 4: 32}
    num_labels = {8: 8, 4: 8}
    match_kernels = {8: 1, 4: 1}

    key = jax.random.PRNGKey(0)
    pkey, xkey, skey = jax.random.split(key, 3)
    params, _ = build_generator_params(
        pkey, size, semantic_dim, channels, num_labels, match_kernels)

    source_image = jax.random.normal(xkey, (2, 3, size, size), jnp.float32)
    skeleton = jax.random.normal(skey, (2, semantic_dim, size, size), jnp.float32)

    out = generator_forward(params, source_image, skeleton)
    jax.block_until_ready(out['fake_image'])
    assert out['fake_image'].shape == (2, 3, size, size)
    assert len(out['info']['encoder_output']) == 2
    print("KERNEL_OK")
</pallas_src>

<mosaic_0001>
module attributes {stable_mosaic.version = 11 : i64} {
  func.func @_conv_tap_kernel(%arg0: i32, %arg1: memref<1x18x18x4xbf16, #tpu.memory_space<vmem>>, %arg2: memref<9x4x32xbf16, #tpu.memory_space<vmem>>, %arg3: memref<1x32xf32, #tpu.memory_space<vmem>>, %arg4: memref<1x16x16x32xbf16, #tpu.memory_space<vmem>>) attributes {dimension_semantics = [#tpu.dimension_semantics<parallel>], iteration_bounds = array<i64: 2>, scalar_prefetch = 0 : i64, scratch_operands = 0 : i64, tpu.core_type = #tpu.core_type<tc>, window_params = [{transform_indices = @transform_0, window_bounds = array<i64: 1, 18, 18, 4>}, {pipeline_mode = #tpu.pipeline_mode<synchronous>, transform_indices = @transform_1, window_bounds = array<i64: 9, 4, 32>}, {pipeline_mode = #tpu.pipeline_mode<synchronous>, transform_indices = @transform_2, window_bounds = array<i64: 1, 32>}, {transform_indices = @transform_3, window_bounds = array<i64: 1, 16, 16, 32>}]} {
    %c0 = arith.constant 0 : index
    %c0_0 = arith.constant 0 : index
    %c0_1 = arith.constant 0 : index
    %c0_2 = arith.constant 0 : index
    %0 = vector.load %arg1[%c0, %c0_0, %c0_1, %c0_2] : memref<1x18x18x4xbf16, #tpu.memory_space<vmem>>, vector<1x18x18x4xbf16>
    %1 = vector.shape_cast %0 : vector<1x18x18x4xbf16> to vector<18x18x4xbf16>
    %cst = arith.constant 0.000000e+00 : f32
    %2 = vector.broadcast %cst : f32 to vector<256x32xf32>
    %3 = vector.extract_strided_slice %1 {offsets = [0, 0, 0], sizes = [16, 16, 4], strides = [1, 1, 1]} : vector<18x18x4xbf16> to vector<16x16x4xbf16>
    %4 = vector.shape_cast %3 : vector<16x16x4xbf16> to vector<256x4xbf16>
    %c0_3 = arith.constant 0 : index
    %c0_4 = arith.constant 0 : index
    %c0_5 = arith.constant 0 : index
    %5 = vector.load %arg2[%c0_3, %c0_4, %c0_5] : memref<9x4x32xbf16, #tpu.memory_space<vmem>>, vector<1x4x32xbf16>
    %6 = vector.shape_cast %5 : vector<1x4x32xbf16> to vector<4x32xbf16>
    %cst_6 = arith.constant dense<0.000000e+00> : vector<256x32xf32>
    %7 = tpu.matmul %4, %6, %cst_6 {dimension_numbers = #tpu.dot_dimension_numbers<[1], [0], [0], [1], [0, 0, 1, 1], [], []>} : vector<256x4xbf16>, vector<4x32xbf16>, vector<256x32xf32> -> vector<256x32xf32>
    %8 = arith.addf %2, %7 : vector<256x32xf32>
    %9 = vector.extract_strided_slice %1 {offsets = [0, 1, 0], sizes = [16, 16, 4], strides = [1, 1, 1]} : vector<18x18x4xbf16> to vector<16x16x4xbf16>
    %10 = vector.shape_cast %9 : vector<16x16x4xbf16> to vector<256x4xbf16>
    %c1 = arith.constant 1 : index
    %c0_7 = arith.constant 0 : index
    %c0_8 = arith.constant 0 : index
    %11 = vector.load %arg2[%c1, %c0_7, %c0_8] : memref<9x4x32xbf16, #tpu.memory_space<vmem>>, vector<1x4x32xbf16>
    %12 = vector.shape_cast %11 : vector<1x4x32xbf16> to vector<4x32xbf16>
    %cst_9 = arith.constant dense<0.000000e+00> : vector<256x32xf32>
    %13 = tpu.matmul %10, %12, %cst_9 {dimension_numbers = #tpu.dot_dimension_numbers<[1], [0], [0], [1], [0, 0, 1, 1], [], []>} : vector<256x4xbf16>, vector<4x32xbf16>, vector<256x32xf32> -> vector<256x32xf32>
    %14 = arith.addf %8, %13 : vector<256x32xf32>
    %15 = vector.extract_strided_slice %1 {offsets = [0, 2, 0], sizes = [16, 16, 4], strides = [1, 1, 1]} : vector<18x18x4xbf16> to vector<16x16x4xbf16>
    %16 = vector.shape_cast %15 : vector<16x16x4xbf16> to vector<256x4xbf16>
    %c2 = arith.constant 2 : index
    %c0_10 = arith.constant 0 : index
    %c0_11 = arith.constant 0 : index
    %17 = vector.load %arg2[%c2, %c0_10, %c0_11] : memref<9x4x32xbf16, #tpu.memory_space<vmem>>, vector<1x4x32xbf16>
    %18 = vector.shape_cast %17 : vector<1x4x32xbf16> to vector<4x32xbf16>
    %cst_12 = arith.constant dense<0.000000e+00> : vector<256x32xf32>
    %19 = tpu.matmul %16, %18, %cst_12 {dimension_numbers = #tpu.dot_dimension_numbers<[1], [0], [0], [1], [0, 0, 1, 1], [], []>} : vector<256x4xbf16>, vector<4x32xbf16>, vector<256x32xf32> -> vector<256x32xf32>
    %20 = arith.addf %14, %19 : vector<256x32xf32>
    %21 = vector.extract_strided_slice %1 {offsets = [1, 0, 0], sizes = [16, 16, 4], strides = [1, 1, 1]} : vector<18x18x4xbf16> to vector<16x16x4xbf16>
    %22 = vector.shape_cast %21 : vector<16x16x4xbf16> to vector<256x4xbf16>
    %c3 = arith.constant 3 : index
    %c0_13 = arith.constant 0 : index
    %c0_14 = arith.constant 0 : index
    %23 = vector.load %arg2[%c3, %c0_13, %c0_14] : memref<9x4x32xbf16, #tpu.memory_space<vmem>>, vector<1x4x32xbf16>
    %24 = vector.shape_cast %23 : vector<1x4x32xbf16> to vector<4x32xbf16>
    %cst_15 = arith.constant dense<0.000000e+00> : vector<256x32xf32>
    %25 = tpu.matmul %22, %24, %cst_15 {dimension_numbers = #tpu.dot_dimension_numbers<[1], [0], [0], [1], [0, 0, 1, 1], [], []>} : vector<256x4xbf16>, vector<4x32xbf16>, vector<256x32xf32> -> vector<256x32xf32>
    %26 = arith.addf %20, %25 : vector<256x32xf32>
    %27 = vector.extract_strided_slice %1 {offsets = [1, 1, 0], sizes = [16, 16, 4], strides = [1, 1, 1]} : vector<18x18x4xbf16> to vector<16x16x4xbf16>
    %28 = vector.shape_cast %27 : vector<16x16x4xbf16> to vector<256x4xbf16>
    %c4 = arith.constant 4 : index
    %c0_16 = arith.constant 0 : index
    %c0_17 = arith.constant 0 : index
    %29 = vector.load %arg2[%c4, %c0_16, %c0_17] : memref<9x4x32xbf16, #tpu.memory_space<vmem>>, vector<1x4x32xbf16>
    %30 = vector.shape_cast %29 : vector<1x4x32xbf16> to vector<4x32xbf16>
    %cst_18 = arith.constant dense<0.000000e+00> : vector<256x32xf32>
    %31 = tpu.matmul %28, %30, %cst_18 {dimension_numbers = #tpu.dot_dimension_numbers<[1], [0], [0], [1], [0, 0, 1, 1], [], []>} : vector<256x4xbf16>, vector<4x32xbf16>, vector<256x32xf32> -> vector<256x32xf32>
    %32 = arith.addf %26, %31 : vector<256x32xf32>
    %33 = vector.extract_strided_slice %1 {offsets = [1, 2, 0], sizes = [16, 16, 4], strides = [1, 1, 1]} : vector<18x18x4xbf16> to vector<16x16x4xbf16>
    %34 = vector.shape_cast %33 : vector<16x16x4xbf16> to vector<256x4xbf16>
    %c5 = arith.constant 5 : index
    %c0_19 = arith.constant 0 : index
    %c0_20 = arith.constant 0 : index
    %35 = vector.load %arg2[%c5, %c0_19, %c0_20] : memref<9x4x32xbf16, #tpu.memory_space<vmem>>, vector<1x4x32xbf16>
    %36 = vector.shape_cast %35 : vector<1x4x32xbf16> to vector<4x32xbf16>
    %cst_21 = arith.constant dense<0.000000e+00> : vector<256x32xf32>
    %37 = tpu.matmul %34, %36, %cst_21 {dimension_numbers = #tpu.dot_dimension_numbers<[1], [0], [0], [1], [0, 0, 1, 1], [], []>} : vector<256x4xbf16>, vector<4x32xbf16>, vector<256x32xf32> -> vector<256x32xf32>
    %38 = arith.addf %32, %37 : vector<256x32xf32>
    %39 = vector.extract_strided_slice %1 {offsets = [2, 0, 0], sizes = [16, 16, 4], strides = [1, 1, 1]} : vector<18x18x4xbf16> to vector<16x16x4xbf16>
    %40 = vector.shape_cast %39 : vector<16x16x4xbf16> to vector<256x4xbf16>
    %c6 = arith.constant 6 : index
    %c0_22 = arith.constant 0 : index
    %c0_23 = arith.constant 0 : index
    %41 = vector.load %arg2[%c6, %c0_22, %c0_23] : memref<9x4x32xbf16, #tpu.memory_space<vmem>>, vector<1x4x32xbf16>
    %42 = vector.shape_cast %41 : vector<1x4x32xbf16> to vector<4x32xbf16>
    %cst_24 = arith.constant dense<0.000000e+00> : vector<256x32xf32>
    %43 = tpu.matmul %40, %42, %cst_24 {dimension_numbers = #tpu.dot_dimension_numbers<[1], [0], [0], [1], [0, 0, 1, 1], [], []>} : vector<256x4xbf16>, vector<4x32xbf16>, vector<256x32xf32> -> vector<256x32xf32>
    %44 = arith.addf %38, %43 : vector<256x32xf32>
    %45 = vector.extract_strided_slice %1 {offsets = [2, 1, 0], sizes = [16, 16, 4], strides = [1, 1, 1]} : vector<18x18x4xbf16> to vector<16x16x4xbf16>
    %46 = vector.shape_cast %45 : vector<16x16x4xbf16> to vector<256x4xbf16>
    %c7 = arith.constant 7 : index
    %c0_25 = arith.constant 0 : index
    %c0_26 = arith.constant 0 : index
    %47 = vector.load %arg2[%c7, %c0_25, %c0_26] : memref<9x4x32xbf16, #tpu.memory_space<vmem>>, vector<1x4x32xbf16>
    %48 = vector.shape_cast %47 : vector<1x4x32xbf16> to vector<4x32xbf16>
    %cst_27 = arith.constant dense<0.000000e+00> : vector<256x32xf32>
    %49 = tpu.matmul %46, %48, %cst_27 {dimension_numbers = #tpu.dot_dimension_numbers<[1], [0], [0], [1], [0, 0, 1, 1], [], []>} : vector<256x4xbf16>, vector<4x32xbf16>, vector<256x32xf32> -> vector<256x32xf32>
    %50 = arith.addf %44, %49 : vector<256x32xf32>
    %51 = vector.extract_strided_slice %1 {offsets = [2, 2, 0], sizes = [16, 16, 4], strides = [1, 1, 1]} : vector<18x18x4xbf16> to vector<16x16x4xbf16>
    %52 = vector.shape_cast %51 : vector<16x16x4xbf16> to vector<256x4xbf16>
    %c8 = arith.constant 8 : index
    %c0_28 = arith.constant 0 : index
    %c0_29 = arith.constant 0 : index
    %53 = vector.load %arg2[%c8, %c0_28, %c0_29] : memref<9x4x32xbf16, #tpu.memory_space<vmem>>, vector<1x4x32xbf16>
    %54 = vector.shape_cast %53 : vector<1x4x32xbf16> to vector<4x32xbf16>
    %cst_30 = arith.constant dense<0.000000e+00> : vector<256x32xf32>
    %55 = tpu.matmul %52, %54, %cst_30 {dimension_numbers = #tpu.dot_dimension_numbers<[1], [0], [0], [1], [0, 0, 1, 1], [], []>} : vector<256x4xbf16>, vector<4x32xbf16>, vector<256x32xf32> -> vector<256x32xf32>
    %56 = arith.addf %50, %55 : vector<256x32xf32>
    %c0_31 = arith.constant 0 : index
    %c0_32 = arith.constant 0 : index
    %57 = vector.load %arg3[%c0_31, %c0_32] : memref<1x32xf32, #tpu.memory_space<vmem>>, vector<1x32xf32>
    %58 = vector.broadcast %57 : vector<1x32xf32> to vector<256x32xf32>
    %59 = arith.addf %56, %58 : vector<256x32xf32>
    %cst_33 = arith.constant 0.000000e+00 : f32
    %60 = vector.broadcast %cst_33 : f32 to vector<256x32xf32>
    %61 = arith.cmpf oge, %59, %60 : vector<256x32xf32>
    %cst_34 = arith.constant 2.000000e-01 : f32
    %62 = vector.broadcast %cst_34 : f32 to vector<256x32xf32>
    %63 = arith.mulf %62, %59 : vector<256x32xf32>
    %64 = arith.select %61, %59, %63 : vector<256x32xi1>, vector<256x32xf32>
    %cst_35 = arith.constant 1.41421354 : f32
    %65 = vector.broadcast %cst_35 : f32 to vector<256x32xf32>
    %66 = arith.mulf %64, %65 : vector<256x32xf32>
    %67 = vector.shape_cast %66 : vector<256x32xf32> to vector<16x16x32xf32>
    %68 = arith.truncf %67 : vector<16x16x32xf32> to vector<16x16x32xbf16>
    %c0_36 = arith.constant 0 : index
    %c0_37 = arith.constant 0 : index
    %c0_38 = arith.constant 0 : index
    %c0_39 = arith.constant 0 : index
    %69 = vector.load %arg4[%c0_36, %c0_37, %c0_38, %c0_39] : memref<1x16x16x32xbf16, #tpu.memory_space<vmem>>, vector<1x16x16x32xbf16>
    %70 = vector.shape_cast %69 : vector<1x16x16x32xbf16> to vector<16x16x32xbf16>
    %71 = vector.shape_cast %68 : vector<16x16x32xbf16> to vector<1x16x16x32xbf16>
    tpu.vector_store %arg4[%c0_36, %c0_37, %c0_38, %c0_39], %71 {strides = array<i32>} : memref<1x16x16x32xbf16, #tpu.memory_space<vmem>>, vector<1x16x16x32xbf16>,
    return
  }
  func.func @transform_0(%arg0: i32) -> (i32, i32, i32, i32) {
    %c0_i32 = arith.constant 0 : i32
    %c0_i32_0 = arith.constant 0 : i32
    %c0_i32_1 = arith.constant 0 : i32
    %c0_i32_2 = arith.constant 0 : i32
    return %arg0, %c0_i32, %c0_i32_0, %c0_i32_1 : i32, i32, i32, i32
  }
  func.func @transform_1(%arg0: i32) -> (i32, i32, i32) {
    %c0_i32 = arith.constant 0 : i32
    %c0_i32_0 = arith.constant 0 : i32
    %c0_i32_1 = arith.constant 0 : i32
    %c0_i32_2 = arith.constant 0 : i32
    return %c0_i32, %c0_i32_0, %c0_i32_1 : i32, i32, i32
  }
  func.func @transform_2(%arg0: i32) -> (i32, i32) {
    %c0_i32 = arith.constant 0 : i32
    %c0_i32_0 = arith.constant 0 : i32
    %c0_i32_1 = arith.constant 0 : i32
    return %c0_i32, %c0_i32_0 : i32, i32
  }
  func.func @transform_3(%arg0: i32) -> (i32, i32, i32, i32) {
    %c0_i32 = arith.constant 0 : i32
    %c0_i32_0 = arith.constant 0 : i32
    %c0_i32_1 = arith.constant 0 : i32
    %c0_i32_2 = arith.constant 0 : i32
    return %arg0, %c0_i32, %c0_i32_0, %c0_i32_1 : i32, i32, i32, i32
  }
}

</mosaic_0001>

<bundles_post_ra>
// kernel: tpu_custom_call.1
= control target key start
LH: loop header
LB: loop body
LE: loop exit
PB: predicated region body
PF: predicated region fallthrough
CT: control target
= control target key end

     0   :  { %8 = vsyncpa [#allocation3], 0  ;;  %s5850_s0 = inlined_call_operand.vmem [shape: bf16[2,18,18,4], index: 0, kind: input, shape index: {}]   ;;  %s5851_s1 = inlined_call_operand.vmem [shape: bf16[9,4,32], index: 1, kind: input, shape index: {}]   ;;  %s5852_s2 = inlined_call_operand.vmem [shape: f32[1,32], index: 2, kind: input, shape index: {}]   ;;  %s5853_s3 = inlined_call_operand.hbm [shape: bf16[2,16,16,32], index: 3, kind: output, shape index: {}]  }
   0x1   :  { %10 = vsyncpa [#allocation3 + $0x1], 0  ;;  %s4206_s12 = smov 0   ;;  %s4208_s13 = smov 0  }
   0x2   :  { %s4210_s14 = smov 0   ;;  %s4212_s15 = smov 0  }
   0x3 LB: > { %s4227_s16 = sadd.s32 4294967295, %s4181_s15   ;;  %s3289_s17 = sadd.s32 4294967294, %s4181_s15   ;;  %s4181_s15 = sphi %s4212_s15, %s6047_s15   ;;  %s4177_s14 = sphi %s4210_s14, %s6046_s14   ;;  %s4173_s13 = sphi %s4208_s13, %s6045_s13   ;;  %s4169_s12 = sphi %s4206_s12, %s6044_s12  }
   0x4   : > { %s4231_s18 = sadd.s32 1, %s4181_s15   ;;  %s91_s19 = sadd.s32 1, %s4177_s14 }
   0x5   : > { %s88_s20 = ssub.s32 %s4181_s15, %s4231_s18  ;;  %p101_p0 = scmp.ne.s32.totalorder %s4177_s14, %s4173_s13 }
   0x6   : > { %p89_p1 = scmp.eq.s32.totalorder %s88_s20, 0  ;;  %p102_p2 = scmp.eq.s32.totalorder %s4227_s16, 1 }
   0x7   : > { %p107_p3 = scmp.ne.s32.totalorder %s4173_s13, %s4169_s12  ;;  %p108_p4 = scmp.eq.s32.totalorder %s3289_s17, 1 }
   0x8   : > { %s4242_s21 = scalar_select %p89_p1, %s4177_s14, %s91_s19  }
   0x9   : > { %p4244_p5 = por %p102_p2, %p101_p0  ;;  %p4248_p6 = por %p108_p4, %p107_p3 }
   0xa   : > { %p3292_p7 = scmp.ge.s32.totalorder %s4181_s15, 1  ;;  %p140_p8 = scmp.lt.s32.totalorder %s4181_s15, 3 }
   0xc   : > { %p141_p9 = pnand %p3292_p7, %p140_p8 }
   0xe   : > { %144 = sbr.rel (%p141_p9) target bundleno = 585 (0x249), region = 32 }
  0x13   : > { %v3295_v0 = vld [vmem:[%s5851_s1 + $0x2] sm:$0x3]  ;;  %vm711_vm0 = vcmask 1041408   ;;  %p164_p10 = scmp.lt.s32.totalorder %s4227_s16, 1  ;;  %v224_v2 = vld [vmem:[%s5851_s1] sm:$0x3] }
  0x14   : > { %4052 = vmatprep.subr.msk.bf16.mxu1 %vm711_vm0, %v3295_v0  ;;  %4051 = vmatprep.subr.msk.bf16.mxu0 %vm711_vm0, %v3295_v0  ;;  %v713_v1 = vsel %vm711_vm0, %v3295_v0, 0  ;;  %v3376_v3 = vld [vmem:[%s5851_s1 + $0x4] sm:$0x3]  ;;  %vm225_vm1 = vsmask.f32 3328  ;;  %v4276_v4 = vsel %vm711_vm0, %v224_v2, 0 }
  0x15   : > { %4050 = vmatpush3.bf16.msra.mxu1 %v713_v1  ;;  %3744 = vmatpush3.bf16.msra.mxu0 %v713_v1  ;;  %s165_s28 = scalar_select %p164_p10, %s4227_s16, 1  ;;  %vm226_vm2 = vsmask.f32 7440  ;;  %v4279_v5 = vsel %vm711_vm0, %v3376_v3, 0  ;;  %vm662_vm3 = vcmask 31744   ;;  %v5899_v32 = vmov 0 }
  0x16   : > { %4053 = vmatprep.subr.msk.bf16.mxu1 %vm711_vm0, %v224_v2  ;;  %4054 = vmatprep.subr.msk.bf16.mxu0 %vm711_vm0, %v3376_v3  ;;  %vm4318_vm4 = vmor %vm225_vm1, %vm226_vm2  ;;  %vm1184_vm5 = vcmask 1042432   ;;  %vm1185_vm6 = vcmask 1046532   ;;  %vm3180_vm8 = vcmask 257024   ;;  %s4183_s19 = smov [#allocation2]  }
  0x17   : > { %s4061_s4 = smul.u32 216, %s165_s28  ;;  %v5900_v32 = vsel %vm4318_vm4, 4294967295, %v5899_v32  ;;  %vm4641_vm7 = vmor %vm1184_vm5, %vm1185_vm6  ;;  %s4125_s20 = sshll.u32 %s4183_s19, 4  ;;  %s4126_s20 = int_to_ptr.vmem [resolvable:$false] %s4125_s20 }
  0x18   : > { %5901 = vst [vmem:[#allocation5_spill] sm:$0xff] %v5900_v32  ;;  %s4127_s24 = scalar_lea.vmem %s4126_s20, 4096 }
  0x19   : > { %s4273_s7 = scalar_lea.vmem %s5850_s0, %s4061_s4  ;;  %s161_s4 = sand.u32 1, %s4173_s13  }
  0x1a   : > { %v4282_v6 = vld [vmem:[%s4273_s7] sm:$0xf]  ;;  %v4285_v7 = vld [vmem:[%s4273_s7 + $0x4] sm:$0xf]  ;;  %v4288_v8 = vld [vmem:[%s4273_s7 + $0x8] sm:$0x1] }
  0x1b   : > { %v229_v9 = vshrl.u32 %v4282_v6, 16  ;;  %v232_v10 = vshll.u32 %v4282_v6, 16  ;;  %v238_v11 = vshll.u32 %v4285_v7, 16  ;;  %v242_v12 = vshrl.u32 %v4285_v7, 16  ;;  %v4295_v13 = vld [vmem:[%s4273_s7 + $0x60] sm:$0xf] }
  0x1c   : > { %v248_v14 = vshll.u32 %v4288_v8, 16  ;;  %v4300_v16 = vld [vmem:[%s4273_s7 + $0x64] sm:$0xf]  ;;  %v4303_v17 = vld [vmem:[%s4273_s7 + $0x68] sm:$0x1]  ;;  %v421_v23 = vshrl.u32 %v4295_v13, 16 }
  0x1d   : > { %v231_v18 = vrot.slane %v229_v9, 4  ;;  %v234_v19 = vrot.slane %v232_v10, 5  ;;  %v240_v20 = vrot.slane %v238_v11, 5  ;;  %v244_v21 = vrot.slane %v242_v12, 4  ;;  %v4311_v30 = vld [vmem:[%s4273_s7 + $0xc] sm:$0xf] }
  0x1e   : > { %v250_v22 = vrot.slane %v248_v14, 5  ;;  %v424_v24 = vshll.u32 %v4295_v13, 16  ;;  %v430_v25 = vshll.u32 %v4300_v16, 16  ;;  %v434_v28 = vshrl.u32 %v4300_v16, 16  ;;  %v4314_v31 = vld [vmem:[%s4273_s7 + $0x10] sm:$0xf] }
  0x1f   : > { %v235_v26 = vor.u32 %v234_v19, %v231_v18  ;;  %v245_v27 = vor.u32 %v244_v21, %v240_v20  ;;  %v440_v29 = vshll.u32 %v4303_v17, 16  ;;  %v423_v33 = vrot.slane %v421_v23, 4  ;;  %v4325_v42 = vld [vmem:[%s4273_s7 + $0x14] sm:$0x1]  ;;  %v4336_v54 = vld [vmem:[%s4273_s7 + $0x6c] sm:$0xf] }
  0x20   : > { %v426_v34 = vrot.slane %v424_v24, 5  ;;  %v432_v35 = vrot.slane %v430_v25, 5  ;;  %v436_v39 = vrot.slane %v434_v28, 4  ;;  %v253_v43 = vshrl.u32 %v4311_v30, 16  ;;  %5902 = vst [vmem:[#allocation6_spill] sm:$0xff] %v4336_v54  ;;  %s3293_s5 = sshll.u32 %s161_s4, 7 }
  0x21   : > { %v236_v37 = vrot.slane %v235_v26, 4  ;;  %v246_v38 = vrot.slane %v245_v27, 4  ;;  %v442_v40 = vrot.slane %v440_v29, 5  ;;  %v256_v44 = vshll.u32 %v4311_v30, 16  ;;  %v4340_v59 = vld [vmem:[%s4273_s7 + $0x70] sm:$0xf] }
  0x22   : > { %v427_v41 = vor.u32 %v426_v34, %v423_v33  ;;  %v262_v45 = vshll.u32 %v4314_v31, 16  ;;  %v437_v48 = vor.u32 %v436_v39, %v432_v35  ;;  %v266_v49 = vshrl.u32 %v4314_v31, 16  ;;  %v4348_v0 = vld [vmem:[%s4273_s7 + $0x74] sm:$0x1]  ;;  %v4354_v10 = vld [vmem:[%s4273_s7 + $0x18] sm:$0xf] }
  0x23   : > { %v241_v46 = vsel %vm4318_vm4, %v236_v37, %v240_v20  ;;  %v251_v47 = vsel %vm4318_vm4, %v246_v38, %v250_v22  ;;  %v255_v52 = vrot.slane %v253_v43, 4  ;;  %v258_v53 = vrot.slane %v256_v44, 5  ;;  %5903 = vst [vmem:[#allocation7_spill] sm:$0xff] %v4348_v0  ;;  %v4363_v23 = vld [vmem:[%s4273_s7 + $0x1c] sm:$0xf]  ;;  %s5664_s6 = scalar_lea.vmem [#allocation2], %s3293_s5 }
  0x24   : > { %v3296_v50 = vcombine.low %v241_v46, %v251_v47  ;;  %v428_v51 = vrot.slane %v427_v41, 4  ;;  %v438_v55 = vrot.slane %v437_v48, 4  ;;  %v264_v56 = vrot.slane %v262_v45, 5  ;;  %v4370_v27 = vld [vmem:[%s4273_s7 + $0x20] sm:$0x1]  ;;  %s3227_s8 = sshll.u32 %s5664_s6, 4  ;;  %s5802_s8 = int_to_ptr.vmem [resolvable:$true] %s3227_s8 }
  0x25   : > { %v268_v57 = vrot.slane %v266_v49, 4  ;;  %v272_v58 = vshll.u32 %v4325_v42, 16  ;;  %v259_v61 = vor.u32 %v258_v53, %v255_v52  ;;  %v445_v9 = vshrl.u32 %v4336_v54, 16  ;;  %v4377_v37 = vld [vmem:[%s4273_s7 + $0x78] sm:$0xf]  ;;  %s4121_s17 = scalar_lea.vmem %s5802_s8, 2048  ;;  %p4128_p0 = scmp.lt.s32.totalorder %s5802_s8, %s4126_s20 }
  0x26   : > { %3745 = vmatprep.mubr.msk.bf16.mxu0 %vm662_vm3, %v3296_v50  ;;  %v433_v60 = vsel %vm4318_vm4, %v428_v51, %v432_v35  ;;  %v443_v1 = vsel %vm4318_vm4, %v438_v55, %v442_v40  ;;  %v448_v14 = vshll.u32 %v4336_v54, 16  ;;  %v454_v18 = vshll.u32 %v4340_v59, 16  ;;  %5905 = vst [vmem:[#allocation9_spill] sm:$0xff] %v4377_v37  ;;  %v4385_v43 = vld [vmem:[%s5851_s1 + $0x8] sm:$0x3]  ;;  %p4122_p11 = scmp.ne.s32.totalorder %s5802_s8, %s4121_s17  ;;  %p4129_p1 = scmp.lt.s32.totalorder %s4127_s24, %s4121_s17 }
  0x27   : > { %v269_v2 = vor.u32 %v268_v57, %v264_v56  ;;  %v274_v3 = vrot.slane %v272_v58, 5  ;;  %v4356_v11 = vcombine.low %v433_v60, %v443_v1  ;;  %v260_v12 = vrot.slane %v259_v61, 4  ;;  %v4390_v48 = vld [vmem:[%s4273_s7 + $0x7c] sm:$0xf]  ;;  %v4398_v58 = vld [vmem:[%s4273_s7 + $0x80] sm:$0x1] }
  0x28   : > { %v447_v20 = vrot.slane %v445_v9, 4  ;;  %v458_v21 = vshrl.u32 %v4340_v59, 16  ;;  %v464_v22 = vshll.u32 %v4348_v0, 16  ;;  %v450_v25 = vrot.slane %v448_v14, 5  ;;  %5907 = vst [vmem:[#allocation11_spill] sm:$0xff] %v4390_v48  ;;  %5908 = vst [vmem:[#allocation12_spill] sm:$0xff] %v4398_v58  ;;  %p4123_p12 = pnand %p4122_p11, %p4244_p5  ;;  %p4130_p2 = por %p4129_p1, %p4128_p0 }
  0x29   : > { %5904 = vst [vmem:[#allocation8_spill] sm:$0xff] %v4356_v11  ;;  %v270_v19 = vrot.slane %v269_v2, 4  ;;  %3761 = vmatprep.mubr.msk.bf16.mxu1 %vm662_vm3, %v4356_v11  ;;  %v265_v24 = vsel %vm4318_vm4, %v260_v12, %v264_v56  ;;  %v456_v26 = vrot.slane %v454_v18, 5  ;;  %v277_v28 = vshrl.u32 %v4354_v10, 16  ;;  %v4412_v18 = vld [vmem:[%s4273_s7 + $0x28] sm:$0xf] }
  0x2a   : > { %v460_v33 = vrot.slane %v458_v21, 4  ;;  %v466_v34 = vrot.slane %v464_v22, 5  ;;  %v280_v35 = vshll.u32 %v4354_v10, 16  ;;  %v451_v39 = vor.u32 %v450_v25, %v447_v20  ;;  %p4124_p13 = pneg %p4123_p12 }
  0x2b   : > { %v275_v29 = vsel %vm4318_vm4, %v270_v19, %v274_v3  ;;  %v279_v40 = vrot.slane %v277_v28, 4  ;;  %v286_v41 = vshll.u32 %v4363_v23, 16  ;;  %v290_v46 = vshrl.u32 %v4363_v23, 16  ;;  %v4404_v3 = vld [vmem:[%s4273_s7 + $0x24] sm:$0xf] }
  0x2c   : > { %v4379_v38 = vcombine.low %v265_v24, %v275_v29  ;;  %v461_v44 = vor.u32 %v460_v33, %v456_v26  ;;  %v282_v45 = vrot.slane %v280_v35, 5  ;;  %v296_v47 = vshll.u32 %v4370_v27, 16  ;;  %v4420_v24 = vld [vmem:[%s5851_s1 + $0x6] sm:$0x3]  ;;  %v4425_v29 = vld [vmem:[%s4273_s7 + $0x2c] sm:$0x1]  ;;  %p4131_p3 = pnand %p4130_p2, %p4124_p13 }
  0x2d   : > { %v452_v49 = vrot.slane %v451_v39, 4  ;;  %v288_v50 = vrot.slane %v286_v41, 5  ;;  %v469_v51 = vshrl.u32 %v4377_v37, 16  ;;  %v472_v52 = vshll.u32 %v4377_v37, 16  ;;  %v4433_v41 = vld [vmem:[%s4273_s7 + $0x84] sm:$0xf] }
  0x2e   : > { %5906 = vst [vmem:[#allocation10_spill] sm:$0xff] %v4379_v38  ;;  %3746 = vmatmul.mubr.msk.bf16.vlgmr.msra.gmra.mxu0 %vm662_vm3, %v4379_v38  ;;  %v462_v53 = vrot.slane %v461_v44, 4  ;;  %v283_v55 = vor.u32 %v282_v45, %v279_v40  ;;  %v292_v56 = vrot.slane %v290_v46, 4  ;;  %v298_v57 = vrot.slane %v296_v47, 5  ;;  %v4580_v38 = vld [vmem:[%s4273_s7 + $0xb0] sm:$0x1] }
  0x2f   : > { %3812 = vmatpush3.bf16.msra.mxu0 %v4279_v5  ;;  %v457_v60 = vsel %vm4318_vm4, %v452_v49, %v456_v26  ;;  %v471_v61 = vrot.slane %v469_v51, 4  ;;  %v474_v1 = vrot.slane %v472_v52, 5  ;;  %v478_v2 = vshll.u32 %v4390_v48, 16  ;;  %v4440_v49 = vld [vmem:[%s4273_s7 + $0x88] sm:$0xf]  ;;  %5920 = vst [vmem:[#allocation24_spill] sm:$0xff] %v4580_v38 }
  0x30   : > { %4056 = vmatprep.subr.msk.bf16.mxu0 %vm711_vm0, %v4385_v43  ;;  %v467_v5 = vsel %vm4318_vm4, %v462_v53, %v466_v34  ;;  %v284_v9 = vrot.slane %v283_v55, 4  ;;  %v293_v12 = vor.u32 %v292_v56, %v288_v50  ;;  %v482_v14 = vshrl.u32 %v4390_v48, 16  ;;  %v4602_v48 = vld [vmem:[%s4273_s7 + $0x5c] sm:$0x1] }
  0x31   : > { %v4414_v19 = vcombine.low %v457_v60, %v467_v5  ;;  %v475_v20 = vor.u32 %v474_v1, %v471_v61  ;;  %v480_v21 = vrot.slane %v478_v2, 5  ;;  %v488_v22 = vshll.u32 %v4398_v58, 16 }
  0x32   : > { %v289_v25 = vsel %vm4318_vm4, %v284_v9, %v288_v50  ;;  %v294_v26 = vrot.slane %v293_v12, 4  ;;  %v484_v28 = vrot.slane %v482_v14, 4  ;;  %v301_v33 = vshrl.u32 %v4404_v3, 16  ;;  %v4459_v9 = vld [vmem:[%s4273_s7 + $0x30] sm:$0xf] }
  0x33   : > { %5909 = vst [vmem:[#allocation13_spill] sm:$0xff] %v4414_v19  ;;  %3762 = vmatmul.mubr.msk.bf16.vlgmr.msra.gmra.mxu1 %vm662_vm3, %v4414_v19  ;;  %v476_v34 = vrot.slane %v475_v20, 4  ;;  %v490_v35 = vrot.slane %v488_v22, 5  ;;  %v304_v39 = vshll.u32 %v4404_v3, 16  ;;  %v310_v40 = vshll.u32 %v4412_v18, 16 }
  0x34   : > { %3778 = vmatpush3.bf16.msra.mxu1 %v4276_v4  ;;  %v299_v44 = vsel %vm4318_vm4, %v294_v26, %v298_v57  ;;  %v485_v45 = vor.u32 %v484_v28, %v480_v21  ;;  %v303_v46 = vrot.slane %v301_v33, 4  ;;  %v314_v47 = vshrl.u32 %v4412_v18, 16  ;;  %v4450_v57 = vld [vmem:[%s4273_s7 + $0x8c] sm:$0x1]  ;;  %v4464_v22 = vld [vmem:[%s4273_s7 + $0x34] sm:$0xf] }
  0x35   : > { %v4442_v50 = vcombine.low %v289_v25, %v299_v44  ;;  %v481_v51 = vsel %vm4318_vm4, %v476_v34, %v480_v21  ;;  %v306_v52 = vrot.slane %v304_v39, 5  ;;  %v312_v53 = vrot.slane %v310_v40, 5  ;;  %4055 = vmatprep.subr.msk.bf16.mxu1 %vm711_vm0, %v4420_v24 }
  0x36   : > { %v486_v4 = vrot.slane %v485_v45, 4  ;;  %v316_v55 = vrot.slane %v314_v47, 4  ;;  %v320_v56 = vshll.u32 %v4425_v29, 16  ;;  %v493_v60 = vshrl.u32 %v4433_v41, 16 }
  0x37   : > { %5910 = vst [vmem:[#allocation14_spill] sm:$0xff] %v4442_v50  ;;  %3749 = vmatprep.mubr.msk.bf16.mxu0 %vm662_vm3, %v4442_v50  ;;  %v307_v61 = vor.u32 %v306_v52, %v303_v46  ;;  %v496_v1 = vshll.u32 %v4433_v41, 16  ;;  %v502_v2 = vshll.u32 %v4440_v49, 16  ;;  %v506_v5 = vshrl.u32 %v4440_v49, 16  ;;  %v4475_v46 = vld [vmem:[%s4273_s7 + $0x38] sm:$0x1] }
  0x38   : > { %v491_v12 = vsel %vm4318_vm4, %v486_v4, %v490_v35  ;;  %v317_v14 = vor.u32 %v316_v55, %v312_v53  ;;  %v322_v20 = vrot.slane %v320_v56, 5  ;;  %v495_v21 = vrot.slane %v493_v60, 4  ;;  %v4480_v52 = vld [vmem:[%s4273_s7 + $0x90] sm:$0xf] }
  0x39   : > { %v4466_v25 = vcombine.low %v481_v51, %v491_v12  ;;  %v308_v26 = vrot.slane %v307_v61, 4  ;;  %v498_v28 = vrot.slane %v496_v1, 5  ;;  %v504_v33 = vrot.slane %v502_v2, 5  ;;  %v4485_v61 = vld [vmem:[%s4273_s7 + $0x94] sm:$0xf] }
  0x3a   : > { %v318_v34 = vrot.slane %v317_v14, 4  ;;  %v508_v39 = vrot.slane %v506_v5, 4  ;;  %v512_v40 = vshll.u32 %v4450_v57, 16  ;;  %v325_v44 = vshrl.u32 %v4459_v9, 16 }
  0x3b   : > { %5911 = vst [vmem:[#allocation15_spill] sm:$0xff] %v4466_v25  ;;  %3765 = vmatprep.mubr.msk.bf16.mxu1 %vm662_vm3, %v4466_v25  ;;  %v313_v35 = vsel %vm4318_vm4, %v308_v26, %v312_v53  ;;  %v499_v45 = vor.u32 %v498_v28, %v495_v21  ;;  %v328_v47 = vshll.u32 %v4459_v9, 16  ;;  %v334_v51 = vshll.u32 %v4464_v22, 16  ;;  %v4531_v25 = vld [vmem:[%s4273_s7 + $0xa0] sm:$0xf] }
  0x3c   : > { %v323_v4 = vsel %vm4318_vm4, %v318_v34, %v322_v20  ;;  %v509_v55 = vor.u32 %v508_v39, %v504_v33  ;;  %v514_v56 = vrot.slane %v512_v40, 5  ;;  %v327_v60 = vrot.slane %v325_v44, 4  ;;  %v4497_v34 = vld [vmem:[%s4273_s7 + $0x98] sm:$0x1]  ;;  %v4502_v44 = vld [vmem:[%s4273_s7 + $0x3c] sm:$0xf] }
  0x3d   : > { %v4487_v53 = vcombine.low %v313_v35, %v323_v4  ;;  %v500_v1 = vrot.slane %v499_v45, 4  ;;  %v330_v2 = vrot.slane %v328_v47, 5  ;;  %v336_v5 = vrot.slane %v334_v51, 5  ;;  %v4507_v4 = vld [vmem:[%s4273_s7 + $0x40] sm:$0xf] }
  0x3e   : > { %v510_v12 = vrot.slane %v509_v55, 4  ;;  %v338_v14 = vshrl.u32 %v4464_v22, 16  ;;  %v344_v21 = vshll.u32 %v4475_v46, 16  ;;  %v517_v20 = vshrl.u32 %v4480_v52, 16 }
  0x3f   : > { %5912 = vst [vmem:[#allocation16_spill] sm:$0xff] %v4487_v53  ;;  %3750 = vmatmul.mubr.msk.bf16.gmra.mxu0 %vm662_vm3, %v4487_v53  ;;  %v505_v26 = vsel %vm4318_vm4, %v500_v1, %v504_v33  ;;  %v331_v28 = vor.u32 %v330_v2, %v327_v60  ;;  %v520_v39 = vshll.u32 %v4480_v52, 16  ;;  %v526_v40 = vshll.u32 %v4485_v61, 16 }
  0x40   : > { %v515_v35 = vsel %vm4318_vm4, %v510_v12, %v514_v56  ;;  %v340_v45 = vrot.slane %v338_v14, 4  ;;  %v346_v47 = vrot.slane %v344_v21, 5  ;;  %v519_v51 = vrot.slane %v517_v20, 4  ;;  %v4519_v14 = vld [vmem:[%s4273_s7 + $0x44] sm:$0x1] }
  0x41   : > { %v4509_v33 = vcombine.low %v505_v26, %v515_v35  ;;  %v332_v55 = vrot.slane %v331_v28, 4  ;;  %v522_v60 = vrot.slane %v520_v39, 5  ;;  %v528_v1 = vrot.slane %v526_v40, 5  ;;  %v4524_v26 = vld [vmem:[%s4273_s7 + $0x9c] sm:$0xf] }
  0x42   : > { %v341_v2 = vor.u32 %v340_v45, %v336_v5  ;;  %v530_v36 = vshrl.u32 %v4485_v61, 16  ;;  %v536_v63 = vshll.u32 %v4497_v34, 16  ;;  %v349_v15 = vshrl.u32 %v4502_v44, 16 }
  0x43   : > { %5913 = vst [vmem:[#allocation17_spill] sm:$0xff] %v4509_v33  ;;  %3766 = vmatmul.mubr.msk.bf16.gmra.mxu1 %vm662_vm3, %v4509_v33  ;;  %v337_v56 = vsel %vm4318_vm4, %v332_v55, %v336_v5  ;;  %v523_v12 = vor.u32 %v522_v60, %v519_v51  ;;  %v352_v21 = vshll.u32 %v4502_v44, 16  ;;  %v358_v20 = vshll.u32 %v4507_v4, 16 }
  0x44   : > { %v342_v28 = vrot.slane %v341_v2, 4  ;;  %v532_v39 = vrot.slane %v530_v36, 4  ;;  %v538_v40 = vrot.slane %v536_v63, 5  ;;  %v351_v35 = vrot.slane %v349_v15, 4 }
  0x45   : > { %v524_v45 = vrot.slane %v523_v12, 4  ;;  %v354_v62 = vrot.slane %v352_v21, 5  ;;  %v360_v33 = vrot.slane %v358_v20, 5  ;;  %v362_v5 = vshrl.u32 %v4507_v4, 16  ;;  %v4539_v21 = vld [vmem:[%s4273_s7 + $0xa4] sm:$0x1] }
  0x46   : > { %v347_v51 = vsel %vm4318_vm4, %v342_v28, %v346_v47  ;;  %v533_v55 = vor.u32 %v532_v39, %v528_v1  ;;  %v368_v60 = vshll.u32 %v4519_v14, 16  ;;  %v541_v2 = vshrl.u32 %v4524_v26, 16  ;;  %5915 = vst [vmem:[#allocation19_spill] sm:$0xff] %v4539_v21  ;;  %v4542_v20 = vld [vmem:[%s4273_s7 + $0x48] sm:$0xf] }
  0x47   : > { %v4534_v36 = vcombine.low %v337_v56, %v347_v51  ;;  %v529_v15 = vsel %vm4318_vm4, %v524_v45, %v528_v1  ;;  %v355_v63 = vor.u32 %v354_v62, %v351_v35  ;;  %v364_v12 = vrot.slane %v362_v5, 4 }
  0x48   : > { %v534_v47 = vrot.slane %v533_v55, 4  ;;  %v370_v28 = vrot.slane %v368_v60, 5  ;;  %v543_v39 = vrot.slane %v541_v2, 4  ;;  %v544_v19 = vshll.u32 %v4524_v26, 16  ;;  %v4553_v55 = vld [vmem:[%s4273_s7 + $0x4c] sm:$0xf] }
  0x49   : > { %5914 = vst [vmem:[#allocation18_spill] sm:$0xff] %v4534_v36  ;;  %3753 = vmatprep.mubr.msk.bf16.mxu0 %vm662_vm3, %v4534_v36  ;;  %v356_v56 = vrot.slane %v355_v63, 4  ;;  %v365_v51 = vor.u32 %v364_v12, %v360_v33  ;;  %v550_v1 = vshll.u32 %v4531_v25, 16  ;;  %v554_v62 = vshrl.u32 %v4531_v25, 16  ;;  %v4561_v36 = vld [vmem:[%s4273_s7 + $0x50] sm:$0x1] }
  0x4a   : > { %v539_v35 = vsel %vm4318_vm4, %v534_v47, %v538_v40  ;;  %v546_v45 = vrot.slane %v544_v19, 5  ;;  %v560_v5 = vshll.u32 %v4539_v21, 16  ;;  %v373_v60 = vshrl.u32 %v4542_v20, 16  ;;  %v4564_v47 = vld [vmem:[%s4273_s7 + $0xa8] sm:$0xf] }
  0x4b   : > { %v4556_v2 = vcombine.low %v529_v15, %v539_v35  ;;  %v361_v63 = vsel %vm4318_vm4, %v356_v56, %v360_v33  ;;  %v366_v12 = vrot.slane %v365_v51, 4  ;;  %v552_v11 = vrot.slane %v550_v1, 5  ;;  %5917 = vst [vmem:[#allocation21_spill] sm:$0xff] %v4564_v47 }
  0x4c   : > { %v547_v53 = vor.u32 %v546_v45, %v543_v39  ;;  %v556_v50 = vrot.slane %v554_v62, 4  ;;  %v562_v40 = vrot.slane %v560_v5, 5  ;;  %v375_v19 = vrot.slane %v373_v60, 4  ;;  %v4577_v45 = vld [vmem:[%s4273_s7 + $0xac] sm:$0xf] }
  0x4d   : > { %5916 = vst [vmem:[#allocation20_spill] sm:$0xff] %v4556_v2  ;;  %3769 = vmatprep.mubr.msk.bf16.mxu1 %vm662_vm3, %v4556_v2  ;;  %v371_v15 = vsel %vm4318_vm4, %v366_v12, %v370_v28  ;;  %v376_v33 = vshll.u32 %v4542_v20, 16  ;;  %v382_v56 = vshll.u32 %v4553_v55, 16  ;;  %v386_v51 = vshrl.u32 %v4553_v55, 16  ;;  %5919 = vst [vmem:[#allocation23_spill] sm:$0xff] %v4577_v45 }
  0x4e   : > { %v4573_v1 = vcombine.low %v361_v63, %v371_v15  ;;  %v548_v39 = vrot.slane %v547_v53, 4  ;;  %v557_v62 = vor.u32 %v556_v50, %v552_v11  ;;  %v392_v35 = vshll.u32 %v4561_v36, 16 }
  0x4f   : > { %v378_v5 = vrot.slane %v376_v33, 5  ;;  %v384_v60 = vrot.slane %v382_v56, 5  ;;  %v388_v2 = vrot.slane %v386_v51, 4  ;;  %v565_v28 = vshrl.u32 %v4564_v47, 16  ;;  %v4590_v51 = vld [vmem:[%s4273_s7 + $0x54] sm:$0xf] }
  0x50   : > { %5918 = vst [vmem:[#allocation22_spill] sm:$0xff] %v4573_v1  ;;  %3754 = vmatmul.mubr.msk.bf16.gmra.mxu0 %vm662_vm3, %v4573_v1  ;;  %v553_v53 = vsel %vm4318_vm4, %v548_v39, %v552_v11  ;;  %v558_v50 = vrot.slane %v557_v62, 4  ;;  %v394_v63 = vrot.slane %v392_v35, 5  ;;  %v568_v12 = vshll.u32 %v4564_v47, 16  ;;  %v4597_v62 = vld [vmem:[%s4273_s7 + $0x58] sm:$0xf] }
  0x51   : > { %v379_v15 = vor.u32 %v378_v5, %v375_v19  ;;  %v389_v58 = vor.u32 %v388_v2, %v384_v60  ;;  %v567_v33 = vrot.slane %v565_v28, 4  ;;  %v574_v56 = vshll.u32 %v4577_v45, 16 }
  0x52   : > { %v563_v1 = vsel %vm4318_vm4, %v558_v50, %v562_v40  ;;  %v570_v37 = vrot.slane %v568_v12, 5  ;;  %v578_v11 = vshrl.u32 %v4577_v45, 16  ;;  %v584_v39 = vshll.u32 %v4580_v38, 16 }
  0x53   : > { %v4599_v2 = vcombine.low %v553_v53, %v563_v1  ;;  %v380_v19 = vrot.slane %v379_v15, 4  ;;  %v390_v35 = vrot.slane %v389_v58, 4  ;;  %v576_v5 = vrot.slane %v574_v56, 5 }
  0x54   : > { %v571_v28 = vor.u32 %v570_v37, %v567_v33  ;;  %v580_v0 = vrot.slane %v578_v11, 4  ;;  %v586_v54 = vrot.slane %v584_v39, 5  ;;  %v397_v40 = vshrl.u32 %v4590_v51, 16  ;;  %v4614_v37 = vld [vmem:[%s4273_s7 + $0xb4] sm:$0xf] }
  0x55   : > { %5921 = vst [vmem:[#allocation25_spill] sm:$0xff] %v4599_v2  ;;  %3770 = vmatmul.mubr.msk.bf16.gmra.mxu1 %vm662_vm3, %v4599_v2  ;;  %v385_v50 = vsel %vm4318_vm4, %v380_v19, %v384_v60  ;;  %v395_v1 = vsel %vm4318_vm4, %v390_v35, %v394_v63  ;;  %v400_v58 = vshll.u32 %v4590_v51, 16  ;;  %v406_v53 = vshll.u32 %v4597_v62, 16  ;;  %5922 = vst [vmem:[#allocation26_spill] sm:$0xff] %v4614_v37  ;;  %v4619_v11 = vld [vmem:[%s4273_s7 + $0xb8] sm:$0xf] }
  0x56   : > { %v4616_v12 = vcombine.low %v385_v50, %v395_v1  ;;  %v572_v15 = vrot.slane %v571_v28, 4  ;;  %v581_v33 = vor.u32 %v580_v0, %v576_v5  ;;  %v399_v56 = vrot.slane %v397_v40, 4 }
  0x57   : > { %v402_v39 = vrot.slane %v400_v58, 5  ;;  %v408_v2 = vrot.slane %v406_v53, 5  ;;  %v410_v60 = vshrl.u32 %v4597_v62, 16  ;;  %v416_v63 = vshll.u32 %v4602_v48, 16  ;;  %v4630_v58 = vld [vmem:[%s4273_s7 + $0xbc] sm:$0x1] }
  0x58   : > { %5923 = vst [vmem:[#allocation27_spill] sm:$0xff] %v4616_v12  ;;  %3757 = vmatprep.mubr.msk.bf16.mxu0 %vm662_vm3, %v4616_v12  ;;  %v577_v19 = vsel %vm4318_vm4, %v572_v15, %v576_v5  ;;  %v582_v35 = vrot.slane %v581_v33, 4  ;;  %v589_v28 = vshrl.u32 %v4614_v37, 16  ;;  %v592_v0 = vshll.u32 %v4614_v37, 16 }
  0x59   : > { %v403_v40 = vor.u32 %v402_v39, %v399_v56  ;;  %v412_v50 = vrot.slane %v410_v60, 4  ;;  %v418_v1 = vrot.slane %v416_v63, 5  ;;  %v598_v53 = vshll.u32 %v4619_v11, 16 }
  0x5a   : > { %v587_v38 = vsel %vm4318_vm4, %v582_v35, %v586_v54  ;;  %v591_v47 = vrot.slane %v589_v28, 4  ;;  %v594_v12 = vrot.slane %v592_v0, 5  ;;  %v602_v45 = vshrl.u32 %v4619_v11, 16 }
  0x5b   : > { %v4636_v5 = vcombine.low %v577_v19, %v587_v38  ;;  %v404_v15 = vrot.slane %v403_v40, 4  ;;  %v413_v33 = vor.u32 %v412_v50, %v408_v2  ;;  %v600_v21 = vrot.slane %v598_v53, 5 }
  0x5c   : > { %v595_v37 = vor.u32 %v594_v12, %v591_v47  ;;  %v604_v56 = vrot.slane %v602_v45, 4  ;;  %v608_v39 = vshll.u32 %v4630_v58, 16  ;;  %v3360_v54 = vrot.slane %v4282_v6, 9 }
  0x5d   : > { %3773 = vmatprep.mubr.msk.bf16.mxu1 %vm662_vm3, %v4636_v5  ;;  %v409_v38 = vsel %vm4318_vm4, %v404_v15, %v408_v2  ;;  %v414_v63 = vrot.slane %v413_v33, 4  ;;  %v1189_v47 = vrot.slane %v4285_v7, 5  ;;  %v4653_v45 = vcombine.low %v4311_v30, %v4314_v31 }
  0x5e   : > { %v596_v12 = vrot.slane %v595_v37, 4  ;;  %v605_v19 = vor.u32 %v604_v56, %v600_v21  ;;  %v610_v35 = vrot.slane %v608_v39, 5  ;;  %v3361_v28 = vrot.slane %v4311_v30, 9 }
  0x5f   : > { %v419_v0 = vsel %vm4318_vm4, %v414_v63, %v418_v1  ;;  %v1190_v40 = vsel %vm4641_vm7, %v3360_v54, %v1189_v47  ;;  %v1191_v50 = vrot.slane %v1189_v47, 4  ;;  %v5926_v2 = vrot.slane %v4314_v31, 5 }
  0x60   : > { %v4662_v15 = vcombine.low %v409_v38, %v419_v0  ;;  %v601_v33 = vsel %vm4318_vm4, %v596_v12, %v600_v21  ;;  %v606_v37 = vrot.slane %v605_v19, 4  ;;  %v5928_v1 = vrot.slane %v4288_v8, 5 }
  0x61   : > { %v1198_v53 = vrot.slane %v5926_v2, 4  ;;  %v5927_v56 = vmov %v5926_v2  ;;  %v5929_v54 = vrot.slane %v4325_v42, 5  ;;  %v4680_v63 = vcombine.low %v4354_v10, %v4363_v23 }
  0x62   : > { %v1197_v30 = vsel %vm4641_vm7, %v3361_v28, %v5927_v56  ;;  %v1193_v39 = vsel %vm4641_vm7, %v1191_v50, %v5928_v1  ;;  %v3362_v21 = vrot.slane %v4354_v10, 9  ;;  %3758 = vmatmul.mubr.msk.bf16.gmra.mxu0 %vm662_vm3, %v4662_v15  ;;  %v611_v8 = vsel %vm4318_vm4, %v606_v37, %v610_v35 }
  0x63   : > { %v1200_v38 = vsel %vm4641_vm7, %v1198_v53, %v5929_v54  ;;  %v3377_v31 = vcombine.low %v1190_v40, %v1193_v39  ;;  %v1203_v42 = vrot.slane %v4363_v23, 5  ;;  %v4690_v12 = vcombine.low %v601_v33, %v611_v8 }
  0x64   : > { %v4687_v47 = vcombine.low %v1197_v30, %v1200_v38  ;;  %v1206_v19 = vrot.slane %v4370_v27, 5  ;;  %v1210_v0 = vrot.slane %v4412_v18, 5  ;;  %v3363_v35 = vrot.slane %v4404_v3, 9 }
  0x65   : > { %5930 = vst [vmem:[#allocation28_spill] sm:$0xff] %v4690_v12  ;;  %3813 = vmatprep.mubr.msk.bf16.mxu0 %vm662_vm3, %v3377_v31  ;;  %v1204_v10 = vsel %vm4641_vm7, %v3362_v21, %v1203_v42  ;;  %v1205_v28 = vrot.slane %v1203_v42, 4  ;;  %3774 = vmatmul.mubr.msk.bf16.gmra.mxu1 %vm662_vm3, %v4690_v12  ;;  %v3364_v40 = vrot.slane %v4459_v9, 9  ;;  %v1217_v23 = vrot.slane %v4464_v22, 5 }
  0x66   : > { %v5931_v27 = vcombine.low %v4282_v6, %v4285_v7  ;;  %v1212_v2 = vrot.slane %v1210_v0, 4  ;;  %v1213_v53 = vrot.slane %v4425_v29, 5  ;;  %v1220_v33 = vrot.slane %v4475_v46, 5  ;;  %v4725_v46 = vld [vmem:[%s5851_s1 + $0xc] sm:$0x3] }
  0x67   : > { %v1207_v50 = vsel %vm4641_vm7, %v1205_v28, %v1206_v19  ;;  %v1219_v56 = vrot.slane %v1217_v23, 4  ;;  %v1832_v30 = vsel %vm711_vm0, %v4385_v43, 0  ;;  %v1224_v1 = vrot.slane %v4507_v4, 5  ;;  %v4742_v19 = vld [vmem:[%s5851_s1 + $0xa] sm:$0x3] }
  0x68   : > { %3779 = vmatprep.mubr.msk.bf16.mxu1 %vm662_vm3, %v5931_v27  ;;  %v4710_v37 = vcombine.low %v1204_v10, %v1207_v50  ;;  %v1604_v6 = vsel %vm711_vm0, %v4420_v24, 0  ;;  %v1211_v7 = vsel %vm4641_vm7, %v3363_v35, %v1210_v0  ;;  %v1218_v39 = vsel %vm4641_vm7, %v3364_v40, %v1217_v23 }
  0x69   : > { %v1231_v29 = vrot.slane %v4553_v55, 5  ;;  %v1214_v43 = vsel %vm4641_vm7, %v1212_v2, %v1213_v53  ;;  %v1221_v24 = vsel %vm4641_vm7, %v1219_v56, %v1220_v33  ;;  %v3365_v54 = vrot.slane %v4502_v44, 9 }
  0x6a   : > { %3814 = vmatmul.mubr.msk.bf16.vlgmr.msra.gmra.mxu0 %vm662_vm3, %v4687_v47  ;;  %v1227_v38 = vrot.slane %v4519_v14, 5  ;;  %v1226_v21 = vrot.slane %v1224_v1, 4  ;;  %v3366_v8 = vrot.slane %v4542_v20, 9  ;;  %v1234_v42 = vrot.slane %v4561_v36, 5 }
  0x6b   : > { %3880 = vmatpush3.bf16.msra.mxu0 %v1832_v30  ;;  %3817 = vmatprep.mubr.msk.bf16.mxu0 %vm662_vm3, %v4710_v37  ;;  %v1233_v31 = vrot.slane %v1231_v29, 4  ;;  %v4750_v14 = vcombine.low %v1211_v7, %v1214_v43  ;;  %v4752_v10 = vcombine.low %v1218_v39, %v1221_v24  ;;  %v1225_v36 = vsel %vm4641_vm7, %v3365_v54, %v1224_v1 }
  0x6c   : > { %4058 = vmatprep.subr.msk.bf16.mxu0 %vm711_vm0, %v4725_v46  ;;  %v1228_v28 = vsel %vm4641_vm7, %v1226_v21, %v1227_v38  ;;  %v1232_v0 = vsel %vm4641_vm7, %v3366_v8, %v1231_v29  ;;  %v1238_v40 = vrot.slane %v4597_v62, 5  ;;  %v1248_v23 = vrot.slane %v4303_v17, 5  ;;  %v5932_v8 = vld [vmem:[#allocation19_spill] sm:$0xff] }
  0x6d   : > { %3780 = vmatmul.mubr.msk.bf16.vlgmr.msra.gmra.mxu1 %vm662_vm3, %v4653_v45  ;;  %v1235_v35 = vsel %vm4641_vm7, %v1233_v31, %v1234_v42  ;;  %v3367_v27 = vrot.slane %v4590_v51, 9  ;;  %v3368_v50 = vrot.slane %v4295_v13, 9  ;;  %v1245_v2 = vrot.slane %v4300_v16, 5  ;;  %v5933_v42 = vld [vmem:[#allocation23_spill] sm:$0xff] }
  0x6e   : > { %3846 = vmatpush3.bf16.msra.mxu1 %v1604_v6  ;;  %3783 = vmatprep.mubr.msk.bf16.mxu1 %vm662_vm3, %v4680_v63  ;;  %v4771_v53 = vcombine.low %v4404_v3, %v4412_v18  ;;  %v4775_v33 = vcombine.low %v4459_v9, %v4464_v22  ;;  %v4779_v56 = vcombine.low %v4502_v44, %v4507_v4  ;;  %v1241_v3 = vrot.slane %v4602_v48, 5 }
  0x6f   : > { %4057 = vmatprep.subr.msk.bf16.mxu1 %vm711_vm0, %v4742_v19  ;;  %v4783_v17 = vcombine.low %v4542_v20, %v4553_v55  ;;  %v4787_v30 = vcombine.low %v1225_v36, %v1228_v28  ;;  %v4789_v1 = vcombine.low %v1232_v0, %v1235_v35  ;;  %v4794_v18 = vcombine.low %v4433_v41, %v4440_v49  ;;  %v5934_v36 = vld [vmem:[#allocation21_spill] sm:$0xff] }
  0x70   : > { %v1240_v9 = vrot.slane %v1238_v40, 4  ;;  %v3371_v22 = vrot.slane %v4433_v41, 9  ;;  %v1266_v44 = vrot.slane %v4440_v49, 5  ;;  %v1269_v4 = vrot.slane %v4450_v57, 5 }
  0x71   : > { %v1239_v20 = vsel %vm4641_vm7, %v3367_v27, %v1238_v40  ;;  %v1246_v48 = vsel %vm4641_vm7, %v3368_v50, %v1245_v2  ;;  %v1247_v55 = vrot.slane %v1245_v2, 4  ;;  %v4807_v6 = vcombine.low %v4480_v52, %v4485_v61  ;;  %v5935_v40 = vld [vmem:[#allocation24_spill] sm:$0xff] }
  0x72   : > { %3818 = vmatmul.mubr.msk.bf16.gmra.mxu0 %vm662_vm3, %v4750_v14  ;;  %v1267_v41 = vsel %vm4641_vm7, %v3371_v22, %v1266_v44  ;;  %v1268_v49 = vrot.slane %v1266_v44, 4  ;;  %v3372_v57 = vrot.slane %v4480_v52, 9  ;;  %v1273_v7 = vrot.slane %v4485_v61, 5 }
  0x73   : > { %3821 = vmatprep.mubr.msk.bf16.mxu0 %vm662_vm3, %v4752_v10  ;;  %v1252_v39 = vrot.slane %v4340_v59, 5  ;;  %v1276_v29 = vrot.slane %v4497_v34, 5  ;;  %v4821_v43 = vcombine.low %v4524_v26, %v4531_v25  ;;  %v3373_v24 = vrot.slane %v4524_v26, 9 }
  0x74   : > { %v1242_v54 = vsel %vm4641_vm7, %v1240_v9, %v1241_v3  ;;  %v1270_v52 = vsel %vm4641_vm7, %v1268_v49, %v1269_v4  ;;  %v1274_v61 = vsel %vm4641_vm7, %v3372_v57, %v1273_v7  ;;  %v1275_v38 = vrot.slane %v1273_v7, 4  ;;  %v5936_v3 = vld [vmem:[#allocation26_spill] sm:$0xff]  ;;  %v5937_v57 = vld [vmem:[#allocation11_spill] sm:$0xff] }
  0x75   : > { %3784 = vmatmul.mubr.msk.bf16.gmra.mxu1 %vm662_vm3, %v4771_v53  ;;  %v4830_v21 = vcombine.low %v1267_v41, %v1270_v52  ;;  %v1280_v34 = vrot.slane %v4531_v25, 5  ;;  %v1283_v31 = vrot.slane %v5932_v8, 5  ;;  %v4836_v28 = vcombine.low %v5934_v36, %v5933_v42 }
  0x76   : > { %3787 = vmatprep.mubr.msk.bf16.mxu1 %vm662_vm3, %v4775_v33  ;;  %v1277_v26 = vsel %vm4641_vm7, %v1275_v38, %v1276_v29  ;;  %v3374_v0 = vrot.slane %v5934_v36, 9  ;;  %v1287_v35 = vrot.slane %v5933_v42, 5  ;;  %v1290_v27 = vrot.slane %v5935_v40, 5  ;;  %v5939_v42 = vld [vmem:[#allocation7_spill] sm:$0xff] }
  0x77   : > { %v4845_v50 = vcombine.low %v1274_v61, %v1277_v26  ;;  %v1281_v25 = vsel %vm4641_vm7, %v3373_v24, %v1280_v34  ;;  %v1282_v2 = vrot.slane %v1280_v34, 4  ;;  %v4851_v9 = vcombine.low %v5936_v3, %v4619_v11 }
  0x78   : > { %v1288_v22 = vsel %vm4641_vm7, %v3374_v0, %v1287_v35  ;;  %v1289_v44 = vrot.slane %v1287_v35, 4  ;;  %v3375_v4 = vrot.slane %v5936_v3, 9  ;;  %v1294_v41 = vrot.slane %v4619_v11, 5  ;;  %v5940_v0 = vld [vmem:[#allocation9_spill] sm:$0xff] }
  0x79   : > { %v1249_v49 = vsel %vm4641_vm7, %v1247_v55, %v1248_v23  ;;  %v1259_v7 = vrot.slane %v5937_v57, 5  ;;  %v1284_v29 = vsel %vm4641_vm7, %v1282_v2, %v1283_v31  ;;  %v1297_v24 = vrot.slane %v4630_v58, 5  ;;  %v5938_v55 = vld [vmem:[#allocation6_spill] sm:$0xff] }
  0x7a   : > { %3822 = vmatmul.mubr.msk.bf16.gmra.mxu0 %vm662_vm3, %v4787_v30  ;;  %v4867_v52 = vcombine.low %v1281_v25, %v1284_v29  ;;  %v1291_v61 = vsel %vm4641_vm7, %v1289_v44, %v1290_v27  ;;  %v1295_v11 = vsel %vm4641_vm7, %v3375_v4, %v1294_v41  ;;  %v1296_v38 = vrot.slane %v1294_v41, 4  ;;  %v5941_v27 = vld [vmem:[#allocation12_spill] sm:$0xff]  ;;  %v4954_v4 = vld [vmem:[%s4273_s7 + $0xc0] sm:$0xf]  ;;  %v220_v41 = vld [vmem:[%s4273_s7 + $0xc8] sm:$0x1] }
  0x7b   : > { %3825 = vmatprep.mubr.msk.bf16.mxu0 %vm662_vm3, %v4789_v1  ;;  %v4875_v23 = vcombine.low %v1239_v20, %v1242_v54  ;;  %v3369_v34 = vrot.slane %v5938_v55, 9  ;;  %v4878_v58 = vcombine.low %v1288_v22, %v1291_v61  ;;  %v4880_v8 = vcombine.low %v1246_v48, %v1249_v49  ;;  %v5942_v61 = vld [vmem:[#allocation10_spill] sm:$0xff] }
  0x7c   : > { %v1254_v31 = vrot.slane %v1252_v39, 4  ;;  %v1255_v36 = vrot.slane %v5939_v42, 5  ;;  %v1298_v26 = vsel %vm4641_vm7, %v1296_v38, %v1297_v24  ;;  %v3370_v35 = vrot.slane %v5940_v0, 9  ;;  %v5944_v42 = vld [vmem:[#allocation16_spill] sm:$0xff] }
  0x7d   : > { %3788 = vmatmul.mubr.msk.bf16.gmra.mxu1 %vm662_vm3, %v4779_v56  ;;  %v1261_v40 = vrot.slane %v1259_v7, 4  ;;  %v1262_v25 = vrot.slane %v5941_v27, 5  ;;  %v4887_v2 = vcombine.low %v1295_v11, %v1298_v26  ;;  %v4891_v20 = vcombine.low %v4590_v51, %v4597_v62  ;;  %v5948_v26 = vld [vmem:[#allocation8_spill] sm:$0xff] }
  0x7e   : > { %3791 = vmatprep.mubr.msk.bf16.mxu1 %vm662_vm3, %v4783_v17  ;;  %v4897_v48 = vcombine.low %v4295_v13, %v4300_v16  ;;  %v1253_v54 = vsel %vm4641_vm7, %v3369_v34, %v1252_v39  ;;  %v1256_v3 = vsel %vm4641_vm7, %v1254_v31, %v1255_v36  ;;  %v1260_v51 = vsel %vm4641_vm7, %v3370_v35, %v1259_v7  ;;  %v5943_v34 = vld [vmem:[#allocation14_spill] sm:$0xff]  ;;  %v5947_v36 = vld [vmem:[#allocation27_spill] sm:$0xff] }
  0x7f   : > { %v1263_v62 = vsel %vm4641_vm7, %v1261_v40, %v1262_v25  ;;  %v4913_v13 = vcombine.low %v1253_v54, %v1256_v3  ;;  %v4919_v39 = vcombine.low %v5938_v55, %v4340_v59  ;;  %v4925_v22 = vcombine.low %v5940_v0, %v5937_v57  ;;  %v4948_v59 = vld [vmem:[%s4273_s7 + $0xc4] sm:$0xf]  ;;  %v3501_v55 = vld [vmem:[%s5851_s1 + $0x10] sm:$0x3] }
  0x80   : > { %v4915_v16 = vcombine.low %v1260_v51, %v1263_v62  ;;  %v2030_v44 = vrot.slane %v4948_v59, 5  ;;  %v3445_v49 = vrot.slane %v4954_v4, 9  ;;  %v2033_v7 = vrot.slane %v220_v41, 5  ;;  %v5949_v0 = vld [vmem:[#allocation13_spill] sm:$0xff]  ;;  %v5950_v35 = vld [vmem:[#allocation15_spill] sm:$0xff] }
  0x81   : > { %v2250_v38 = vsel %vm711_vm0, %v4725_v46, 0  ;;  %v2044_v31 = vsel %vm711_vm0, %v4742_v19, 0  ;;  %v5945_v46 = vld [vmem:[#allocation18_spill] sm:$0xff]  ;;  %v5951_v40 = vld [vmem:[#allocation17_spill] sm:$0xff]  ;;  %v1800_v27 = vshrl.u32 %v4954_v4, 16  ;;  %v1803_v25 = vshll.u32 %v4954_v4, 16 }
  0x82   : > { %3826 = vmatmul.mubr.msk.bf16.gmra.mxu0 %vm662_vm3, %v4875_v23  ;;  %v2032_v57 = vrot.slane %v2030_v44, 4  ;;  %v2031_v29 = vsel %vm4641_vm7, %v3445_v49, %v2030_v44  ;;  %v5946_v19 = vld [vmem:[#allocation22_spill] sm:$0xff]  ;;  %v1813_v54 = vshrl.u32 %v4948_v59, 16  ;;  %v1809_v3 = vshll.u32 %v4948_v59, 16 }
  0x83   : > { %3829 = vmatprep.mubr.msk.bf16.mxu0 %vm662_vm3, %v4880_v8  ;;  %v1802_v51 = vrot.slane %v1800_v27, 4  ;;  %v1805_v62 = vrot.slane %v1803_v25, 5 }
  0x84   : > { %v2034_v24 = vsel %vm4641_vm7, %v2032_v57, %v2033_v7  ;;  %v1811_v44 = vrot.slane %v1809_v3, 5  ;;  %v1815_v49 = vrot.slane %v1813_v54, 4  ;;  %v5952_v57 = vld [vmem:[#allocation20_spill] sm:$0xff]  ;;  %v5953_v7 = vld [vmem:[#allocation25_spill] sm:$0xff]  ;;  %v3410_v3 = vcombine.low %v4954_v4, %v4948_v59 }
  0x85   : > { %3792 = vmatmul.mubr.msk.bf16.gmra.mxu1 %vm662_vm3, %v4891_v20  ;;  %v4966_v11 = vcombine.low %v2031_v29, %v2034_v24  ;;  %v1806_v29 = vor.u32 %v1805_v62, %v1802_v51  ;;  %v2690_v51 = vsel %vm711_vm0, %v3501_v55, 0 }
  0x86   : > { %3795 = vmatprep.mubr.msk.bf16.mxu1 %vm662_vm3, %v4897_v48  ;;  %v1816_v24 = vor.u32 %v1815_v49, %v1811_v44 }
  0x8a   : > { %3830 = vmatmul.mubr.msk.bf16.gmra.mxu0 %vm662_vm3, %v4913_v13 }
  0x8b   : > { %3833 = vmatprep.mubr.msk.bf16.mxu0 %vm662_vm3, %v4915_v16 }
  0x8d   : > { %3796 = vmatmul.mubr.msk.bf16.gmra.mxu1 %vm662_vm3, %v4919_v39 }
  0x8e   : > { %3799 = vmatprep.mubr.msk.bf16.mxu1 %vm662_vm3, %v4925_v22 }
  0x92   : > { %3834 = vmatmul.mubr.msk.bf16.gmra.mxu0 %vm662_vm3, %v4830_v21 }
  0x93   : > { %3837 = vmatprep.mubr.msk.bf16.mxu0 %vm662_vm3, %v4845_v50 }
  0x95   : > { %3800 = vmatmul.mubr.msk.bf16.gmra.mxu1 %vm662_vm3, %v4794_v18 }
  0x96   : > { %3803 = vmatprep.mubr.msk.bf16.mxu1 %vm662_vm3, %v4807_v6 }
  0x9a   : > { %3838 = vmatmul.mubr.msk.bf16.gmra.mxu0 %vm662_vm3, %v4867_v52 }
  0x9b   : > { %3841 = vmatprep.mubr.msk.bf16.mxu0 %vm662_vm3, %v4878_v58 }
  0x9d   : > { %3804 = vmatmul.mubr.msk.bf16.gmra.mxu1 %vm662_vm3, %v4821_v43 }
  0x9e   : > { %3807 = vmatprep.mubr.msk.bf16.mxu1 %vm662_vm3, %v4836_v28 }
  0xa2   : > { %3842 = vmatmul.mubr.msk.bf16.gmra.mxu0 %vm662_vm3, %v4887_v2 }
  0xa3   : > { %3881 = vmatprep.mubr.msk.bf16.mxu0 %vm662_vm3, %v5942_v61  ;;  %v1819_v61 = vshll.u32 %v220_v41, 16 }
  0xa5   : > { %3808 = vmatmul.mubr.msk.bf16.gmra.mxu1 %vm662_vm3, %v4851_v9  ;;  %v1821_v27 = vrot.slane %v1819_v61, 5  ;;  %v5158_v61 = vld [vmem:[%s4273_s7 + $0xd0] sm:$0xf] }
  0xa6   : > { %3847 = vmatprep.mubr.msk.bf16.mxu1 %vm662_vm3, %v4653_v45  ;;  %v3482_v45 = vld [vmem:[%s5851_s1 + $0xe] sm:$0x3] }
  0xa7   : > { %v2478_v62 = vsel %vm711_vm0, %v3482_v45, 0 }
  0xaa   : > { %3882 = vmatmul.mubr.msk.bf16.vlgmr.msra.gmra.mxu0 %vm662_vm3, %v5943_v34 }
  0xab   : > { %3948 = vmatpush3.bf16.msra.mxu0 %v2250_v38  ;;  %3885 = vmatprep.mubr.msk.bf16.mxu0 %vm662_vm3, %v5944_v42  ;;  %v1807_v38 = vrot.slane %v1806_v29, 4 }
  0xac   : > { %4060 = vmatprep.subr.msk.bf16.mxu0 %vm711_vm0, %v3501_v55 }
  0xad   : > { %3848 = vmatmul.mubr.msk.bf16.vlgmr.msra.gmra.mxu1 %vm662_vm3, %v4680_v63  ;;  %v1812_v25 = vsel %vm4318_vm4, %v1807_v38, %v1811_v44 }
  0xae   : > { %3914 = vmatpush3.bf16.msra.mxu1 %v2044_v31  ;;  %3851 = vmatprep.mubr.msk.bf16.mxu1 %vm662_vm3, %v4771_v53  ;;  %v1817_v31 = vrot.slane %v1816_v24, 4 }
  0xaf   : > { %4059 = vmatprep.subr.msk.bf16.mxu1 %vm711_vm0, %v3482_v45 }
  0xb0   : > { %v1822_v41 = vsel %vm4318_vm4, %v1817_v31, %v1821_v27 }
  0xb1   : > { %v5048_v54 = vcombine.low %v1812_v25, %v1822_v41 }
  0xb2   : > { %3886 = vmatmul.mubr.msk.bf16.gmra.mxu0 %vm662_vm3, %v5945_v46 }
  0xb3   : > { %3889 = vmatprep.mubr.msk.bf16.mxu0 %vm662_vm3, %v5946_v19  ;;  %5954 = vst [vmem:[#allocation19_spill] sm:$0xff] %v5048_v54 }
  0xb5   : > { %3852 = vmatmul.mubr.msk.bf16.gmra.mxu1 %vm662_vm3, %v4775_v33 }
  0xb6   : > { %3855 = vmatprep.mubr.msk.bf16.mxu1 %vm662_vm3, %v4779_v56 }
  0xba   : > { %3890 = vmatmul.mubr.msk.bf16.gmra.mxu0 %vm662_vm3, %v5947_v36 }
  0xbb   : > { %3893 = vmatprep.mubr.msk.bf16.mxu0 %vm662_vm3, %v4662_v15 }
  0xbd   : > { %3856 = vmatmul.mubr.msk.bf16.gmra.mxu1 %vm662_vm3, %v4783_v17 }
  0xbe   : > { %3859 = vmatprep.mubr.msk.bf16.mxu1 %vm662_vm3, %v4891_v20 }
  0xc2   : > { %3894 = vmatmul.mubr.msk.bf16.gmra.mxu0 %vm662_vm3, %v5948_v26 }
  0xc3   : > { %3897 = vmatprep.mubr.msk.bf16.mxu0 %vm662_vm3, %v5949_v0 }
  0xc5   : > { %3860 = vmatmul.mubr.msk.bf16.gmra.mxu1 %vm662_vm3, %v4897_v48 }
  0xc6   : > { %3863 = vmatprep.mubr.msk.bf16.mxu1 %vm662_vm3, %v4919_v39 }
  0xca   : > { %3898 = vmatmul.mubr.msk.bf16.gmra.mxu0 %vm662_vm3, %v5950_v35 }
  0xcb   : > { %3901 = vmatprep.mubr.msk.bf16.mxu0 %vm662_vm3, %v5951_v40 }
  0xcd   : > { %3864 = vmatmul.mubr.msk.bf16.gmra.mxu1 %vm662_vm3, %v4925_v22 }
  0xce   : > { %3867 = vmatprep.mubr.msk.bf16.mxu1 %vm662_vm3, %v4794_v18 }
  0xd2   : > { %3902 = vmatmul.mubr.msk.bf16.gmra.mxu0 %vm662_vm3, %v5952_v57 }
  0xd3   : > { %3905 = vmatprep.mubr.msk.bf16.mxu0 %vm662_vm3, %v5953_v7 }
  0xd5   : > { %3868 = vmatmul.mubr.msk.bf16.gmra.mxu1 %vm662_vm3, %v4807_v6 }
  0xd6   : > { %3871 = vmatprep.mubr.msk.bf16.mxu1 %vm662_vm3, %v4821_v43 }
  0xda   : > { %3906 = vmatmul.mubr.msk.bf16.gmra.mxu0 %vm662_vm3, %v4636_v5 }
  0xdb   : > { %3909 = vmatprep.mubr.msk.bf16.mxu0 %vm662_vm3, %v4690_v12 }
  0xdd   : > { %3872 = vmatmul.mubr.msk.bf16.gmra.mxu1 %vm662_vm3, %v4836_v28 }
  0xde   : > { %3875 = vmatprep.mubr.msk.bf16.mxu1 %vm662_vm3, %v4851_v9 }
  0xe2   : > { %3910 = vmatmul.mubr.msk.bf16.gmra.mxu0 %vm662_vm3, %v5048_v54 }
  0xe3   : > { %3949 = vmatprep.mubr.msk.bf16.mxu0 %vm662_vm3, %v4680_v63 }
  0xe5   : > { %3876 = vmatmul.mubr.msk.bf16.gmra.mxu1 %vm662_vm3, %v3410_v3 }
  0xe6   : > { %3915 = vmatprep.mubr.msk.bf16.mxu1 %vm662_vm3, %v4687_v47 }
  0xea   : > { %3950 = vmatmul.mubr.msk.bf16.vlgmr.msra.gmra.mxu0 %vm662_vm3, %v4771_v53 }
  0xeb   : > { %4016 = vmatpush3.bf16.msra.mxu0 %v2690_v51  ;;  %3953 = vmatprep.mubr.msk.bf16.mxu0 %vm662_vm3, %v4775_v33 }
  0xed   : > { %3916 = vmatmul.mubr.msk.bf16.vlgmr.msra.gmra.mxu1 %vm662_vm3, %v4710_v37 }
  0xee   : > { %3982 = vmatpush3.bf16.msra.mxu1 %v2478_v62  ;;  %3919 = vmatprep.mubr.msk.bf16.mxu1 %vm662_vm3, %v4750_v14  ;;  %v5071_v63 = vpop.f32.mrf.mxu0 }
  0xf0   : > { %v5081_v53 = vpop.f32.mrf.mxu0 }
  0xf2   : > { %3954 = vmatmul.mubr.msk.bf16.gmra.mxu0 %vm662_vm3, %v4779_v56  ;;  %v5087_v56 = vpop.f32.mrf.mxu0 }
  0xf3   : > { %3957 = vmatprep.mubr.msk.bf16.mxu0 %vm662_vm3, %v4783_v17  ;;  %v5077_v47 = vpop.f32.mrf.mxu1 }
  0xf4   : > { %v5097_v59 = vpop.f32.mrf.mxu0 }
  0xf5   : > { %3920 = vmatmul.mubr.msk.bf16.gmra.mxu1 %vm662_vm3, %v4752_v10  ;;  %v5083_v33 = vpop.f32.mrf.mxu1 }
  0xf6   : > { %3923 = vmatprep.mubr.msk.bf16.mxu1 %vm662_vm3, %v4787_v30 }
  0xf7   : > { %v5093_v17 = vpop.f32.mrf.mxu1 }
  0xf9   : > { %v5099_v4 = vpop.f32.mrf.mxu1 }
  0xfa   : > { %3958 = vmatmul.mubr.msk.bf16.gmra.mxu0 %vm662_vm3, %v4891_v20 }
  0xfb   : > { %3961 = vmatprep.mubr.msk.bf16.mxu0 %vm662_vm3, %v4897_v48 }
  0xfd   : > { %3924 = vmatmul.mubr.msk.bf16.gmra.mxu1 %vm662_vm3, %v4789_v1 }
  0xfe   : > { %3927 = vmatprep.mubr.msk.bf16.mxu1 %vm662_vm3, %v4875_v23 }
  0xff   : > { %v5103_v20 = vpop.f32.mrf.mxu0 }
 0x101   : > { %v5113_v55 = vpop.f32.mrf.mxu0 }
 0x102   : > { %3962 = vmatmul.mubr.msk.bf16.gmra.mxu0 %vm662_vm3, %v4919_v39 }
 0x103   : > { %3965 = vmatprep.mubr.msk.bf16.mxu0 %vm662_vm3, %v4925_v22  ;;  %v5109_v48 = vpop.f32.mrf.mxu1  ;;  %v5119_v39 = vpop.f32.mrf.mxu0 }
 0x105   : > { %3928 = vmatmul.mubr.msk.bf16.gmra.mxu1 %vm662_vm3, %v4880_v8  ;;  %v5115_v45 = vpop.f32.mrf.mxu1  ;;  %v5129_v44 = vpop.f32.mrf.mxu0 }
 0x106   : > { %3931 = vmatprep.mubr.msk.bf16.mxu1 %vm662_vm3, %v4913_v13 }
 0x107   : > { %v5125_v22 = vpop.f32.mrf.mxu1 }
 0x109   : > { %v5131_v49 = vpop.f32.mrf.mxu1 }
 0x10a   : > { %3966 = vmatmul.mubr.msk.bf16.gmra.mxu0 %vm662_vm3, %v4794_v18 }
 0x10b   : > { %3969 = vmatprep.mubr.msk.bf16.mxu0 %vm662_vm3, %v4807_v6 }
 0x10d   : > { %3932 = vmatmul.mubr.msk.bf16.gmra.mxu1 %vm662_vm3, %v4915_v16 }
 0x10e   : > { %3935 = vmatprep.mubr.msk.bf16.mxu1 %vm662_vm3, %v4830_v21 }
 0x110   : > { %v5135_v18 = vpop.f32.mrf.mxu0 }
 0x112   : > { %3970 = vmatmul.mubr.msk.bf16.gmra.mxu0 %vm662_vm3, %v4821_v43  ;;  %v5145_v29 = vpop.f32.mrf.mxu0 }
 0x113   : > { %3973 = vmatprep.mubr.msk.bf16.mxu0 %vm662_vm3, %v4836_v28  ;;  %v5155_v28 = vld [vmem:[%s4273_s7 + $0xcc] sm:$0xf] }
 0x114   : > { %v5151_v43 = vpop.f32.mrf.mxu0 }
 0x115   : > { %3936 = vmatmul.mubr.msk.bf16.gmra.mxu1 %vm662_vm3, %v4845_v50  ;;  %v5141_v6 = vpop.f32.mrf.mxu1 }
 0x116   : > { %5955 = vst [vmem:[#allocation23_spill] sm:$0xff] %v5141_v6  ;;  %3939 = vmatprep.mubr.msk.bf16.mxu1 %vm662_vm3, %v4867_v52  ;;  %v5164_v31 = vpop.f32.mrf.mxu0 }
 0x117   : > { %v5147_v24 = vpop.f32.mrf.mxu1 }
 0x118   : > { %5956 = vst [vmem:[#allocation21_spill] sm:$0xff] %v5147_v24 }
 0x119   : > { %v5162_v38 = vpop.f32.mrf.mxu1 }
 0x11a   : > { %3974 = vmatmul.mubr.msk.bf16.gmra.mxu0 %vm662_vm3, %v4851_v9  ;;  %5957 = vst [vmem:[#allocation24_spill] sm:$0xff] %v5162_v38  ;;  %v3465_v9 = vcombine.low %v5155_v28, %v5158_v61 }
 0x11b   : > { %3977 = vmatprep.mubr.msk.bf16.mxu0 %vm662_vm3, %v3410_v3  ;;  %v5170_v27 = vpop.f32.mrf.mxu1 }
 0x11c   : > { %5958 = vst [vmem:[#allocation26_spill] sm:$0xff] %v5170_v27 }
 0x11d   : > { %3940 = vmatmul.mubr.msk.bf16.gmra.mxu1 %vm662_vm3, %v4878_v58 }
 0x11e   : > { %3943 = vmatprep.mubr.msk.bf16.mxu1 %vm662_vm3, %v4887_v2 }
 0x122   : > { %v5172_v25 = vpop.f32.mrf.mxu0  ;;  %3978 = vmatmul.mubr.msk.bf16.gmra.mxu0 %vm662_vm3, %v3465_v9 }
 0x123   : > { %4017 = vmatprep.mubr.msk.bf16.mxu0 %vm662_vm3, %v4710_v37 }
 0x124   : > { %v5177_v41 = vpop.f32.mrf.mxu0 }
 0x125   : > { %v5179_v3 = vpop.f32.mrf.mxu1  ;;  %3944 = vmatmul.mubr.msk.bf16.gmra.mxu1 %vm662_vm3, %v4966_v11 }
 0x126   : > { %5959 = vst [vmem:[#allocation11_spill] sm:$0xff] %v5179_v3  ;;  %v5183_v51 = vpop.f32.mrf.mxu0  ;;  %3983 = vmatprep.mubr.msk.bf16.mxu1 %vm662_vm3, %v5943_v34 }
 0x127   : > { %v5187_v62 = vpop.f32.mrf.mxu1 }
 0x128   : > { %5960 = vst [vmem:[#allocation6_spill] sm:$0xff] %v5187_v62  ;;  %v5189_v27 = vpop.f32.mrf.mxu0 }
 0x129   : > { %v5191_v9 = vpop.f32.mrf.mxu1 }
 0x12a   : > { %5961 = vst [vmem:[#allocation7_spill] sm:$0xff] %v5191_v9  ;;  %v3815_v38 = vpop.f32.mrf.mxu0  ;;  %4018 = vmatmul.mubr.msk.bf16.vlgmr.msra.gmra.mxu0 %vm662_vm3, %v4750_v14 }
 0x12b   : > { %v5195_v37 = vpop.f32.mrf.mxu1  ;;  %4021 = vmatprep.mubr.msk.bf16.mxu0 %vm662_vm3, %v4752_v10 }
 0x12c   : > { %5962 = vst [vmem:[#allocation9_spill] sm:$0xff] %v5195_v37  ;;  %v1434_v3 = vpop.f32.mrf.mxu0 }
 0x12d   : > { %v3781_v24 = vpop.f32.mrf.mxu1  ;;  %3984 = vmatmul.mubr.msk.bf16.vlgmr.msra.gmra.mxu1 %vm662_vm3, %v5944_v42 }
 0x12e   : > { %v1050_v34 = vadd.f32 %v3781_v24, %v5071_v63  ;;  %v3816_v62 = vpop.f32.mrf.mxu0  ;;  %3987 = vmatprep.mubr.msk.bf16.mxu1 %vm662_vm3, %v5945_v46 }
 0x12f   : > { %v1041_v9 = vpop.f32.mrf.mxu1 }
 0x130   : > { %v5204_v54 = vadd.f32 %v3815_v38, %v1050_v34  ;;  %v1042_v14 = vadd.f32 %v1041_v9, %v5081_v53  ;;  %v1437_v37 = vpop.f32.mrf.mxu0 }
 0x131   : > { %v3782_v6 = vpop.f32.mrf.mxu1 }
 0x132   : > { %v5207_v32 = vadd.f32 %v1434_v3, %v1042_v14  ;;  %v1053_v10 = vadd.f32 %v3782_v6, %v5087_v56  ;;  %v3819_v12 = vpop.f32.mrf.mxu0  ;;  %4022 = vmatmul.mubr.msk.bf16.gmra.mxu0 %vm662_vm3, %v4787_v30 }
 0x133   : > { %v1044_v42 = vpop.f32.mrf.mxu1  ;;  %4025 = vmatprep.mubr.msk.bf16.mxu0 %vm662_vm3, %v4789_v1 }
 0x134   : > { %v5214_v46 = vadd.f32 %v3816_v62, %v1053_v10  ;;  %v1045_v63 = vadd.f32 %v1044_v42, %v5097_v59  ;;  %v1450_v24 = vpop.f32.mrf.mxu0 }
 0x135   : > { %v3785_v53 = vpop.f32.mrf.mxu1  ;;  %3988 = vmatmul.mubr.msk.bf16.gmra.mxu1 %vm662_vm3, %v5946_v19 }
 0x136   : > { %v5219_v38 = vadd.f32 %v1437_v37, %v1045_v63  ;;  %v1066_v56 = vadd.f32 %v3785_v53, %v5103_v20  ;;  %v3820_v6 = vpop.f32.mrf.mxu0  ;;  %3991 = vmatprep.mubr.msk.bf16.mxu1 %vm662_vm3, %v5947_v36 }
 0x137   : > { %v1057_v30 = vpop.f32.mrf.mxu1 }
 0x138   : > { %v5224_v3 = vadd.f32 %v3819_v12, %v1066_v56  ;;  %v1058_v1 = vadd.f32 %v1057_v30, %v5113_v55  ;;  %v1453_v62 = vpop.f32.mrf.mxu0 }
 0x139   : > { %v3786_v59 = vpop.f32.mrf.mxu1 }
 0x13a   : > { %v5227_v9 = vadd.f32 %v1450_v24, %v1058_v1  ;;  %v1069_v34 = vadd.f32 %v3786_v59, %v5119_v39  ;;  %v3823_v19 = vpop.f32.mrf.mxu0  ;;  %4026 = vmatmul.mubr.msk.bf16.gmra.mxu0 %vm662_vm3, %v4875_v23 }
 0x13b   : > { %v1060_v20 = vpop.f32.mrf.mxu1  ;;  %4029 = vmatprep.mubr.msk.bf16.mxu0 %vm662_vm3, %v4880_v8 }
 0x13c   : > { %v5234_v36 = vadd.f32 %v3820_v6, %v1069_v34  ;;  %v1061_v12 = vadd.f32 %v1060_v20, %v5129_v44  ;;  %v1466_v37 = vpop.f32.mrf.mxu0 }
 0x13d   : > { %v3789_v55 = vpop.f32.mrf.mxu1  ;;  %3992 = vmatmul.mubr.msk.bf16.gmra.mxu1 %vm662_vm3, %v4662_v15 }
 0x13e   : > { %v5239_v14 = vadd.f32 %v1453_v62, %v1061_v12  ;;  %v1082_v39 = vadd.f32 %v3789_v55, %v5135_v18  ;;  %v3824_v10 = vpop.f32.mrf.mxu0  ;;  %3995 = vmatprep.mubr.msk.bf16.mxu1 %vm662_vm3, %v5948_v26 }
 0x13f   : > { %v1073_v23 = vpop.f32.mrf.mxu1 }
 0x140   : > { %v5244_v42 = vadd.f32 %v3823_v19, %v1082_v39  ;;  %v1074_v8 = vadd.f32 %v1073_v23, %v5145_v29  ;;  %v1469_v63 = vpop.f32.mrf.mxu0 }
 0x141   : > { %v3790_v44 = vpop.f32.mrf.mxu1 }
 0x142   : > { %v5247_v24 = vadd.f32 %v1466_v37, %v1074_v8  ;;  %v1085_v53 = vadd.f32 %v3790_v44, %v5151_v43  ;;  %v3827_v15 = vpop.f32.mrf.mxu0  ;;  %4030 = vmatmul.mubr.msk.bf16.gmra.mxu0 %vm662_vm3, %v4913_v13  ;;  %v2449_v37 = vshll.u32 %v5155_v28, 16 }
 0x143   : > { %v1076_v18 = vpop.f32.mrf.mxu1  ;;  %4033 = vmatprep.mubr.msk.bf16.mxu0 %vm662_vm3, %v4915_v16 }
 0x144   : > { %v5254_v26 = vadd.f32 %v3824_v10, %v1085_v53  ;;  %v1077_v56 = vadd.f32 %v1076_v18, %v5164_v31  ;;  %v1482_v6 = vpop.f32.mrf.mxu0  ;;  %v2451_v44 = vrot.slane %v2449_v37, 5 }
 0x145   : > { %v3793_v29 = vpop.f32.mrf.mxu1  ;;  %3996 = vmatmul.mubr.msk.bf16.gmra.mxu1 %vm662_vm3, %v5949_v0 }
 0x146   : > { %v5259_v30 = vadd.f32 %v1469_v63, %v1077_v56  ;;  %v1098_v43 = vadd.f32 %v3793_v29, %v5172_v25  ;;  %v3828_v1 = vpop.f32.mrf.mxu0  ;;  %3999 = vmatprep.mubr.msk.bf16.mxu1 %vm662_vm3, %v5950_v35 }
 0x147   : > { %v1089_v13 = vpop.f32.mrf.mxu1 }
 0x148   : > { %v5264_v62 = vadd.f32 %v3827_v15, %v1098_v43  ;;  %v1090_v16 = vadd.f32 %v1089_v13, %v5177_v41  ;;  %v1485_v59 = vpop.f32.mrf.mxu0  ;;  %v2446_v41 = vshrl.u32 %v5155_v28, 16 }
 0x149   : > { %v3794_v31 = vpop.f32.mrf.mxu1 }
 0x14a   : > { %v5267_v34 = vadd.f32 %v1482_v6, %v1090_v16  ;;  %v1101_v19 = vadd.f32 %v3794_v31, %v5183_v51  ;;  %v3831_v0 = vpop.f32.mrf.mxu0  ;;  %4034 = vmatmul.mubr.msk.bf16.gmra.mxu0 %vm662_vm3, %v4830_v21  ;;  %v2455_v51 = vshll.u32 %v5158_v61, 16  ;;  %v2459_v21 = vshrl.u32 %v5158_v61, 16 }
 0x14b   : > { %v1092_v25 = vpop.f32.mrf.mxu1  ;;  %4037 = vmatprep.mubr.msk.bf16.mxu0 %vm662_vm3, %v4845_v50 }
 0x14c   : > { %v5274_v35 = vadd.f32 %v3828_v1, %v1101_v19  ;;  %v1093_v20 = vadd.f32 %v1092_v25, %v5189_v27  ;;  %v1498_v12 = vpop.f32.mrf.mxu0  ;;  %v2457_v15 = vrot.slane %v2455_v51, 5  ;;  %v2461_v18 = vrot.slane %v2459_v21, 4 }
 0x14d   : > { %v3797_v55 = vpop.f32.mrf.mxu1  ;;  %4000 = vmatmul.mubr.msk.bf16.gmra.mxu1 %vm662_vm3, %v5951_v40  ;;  %v2448_v40 = vrot.slane %v2446_v41, 4  ;;  %v3500_v19 = vrot.slane %v5155_v28, 9 }
 0x14e   : > { %v5283_v39 = vadd.f32 %v1485_v59, %v1093_v20  ;;  %v1114_v50 = vadd.f32 %v3797_v55, %v5077_v47  ;;  %v3832_v10 = vpop.f32.mrf.mxu0  ;;  %4003 = vmatprep.mubr.msk.bf16.mxu1 %vm662_vm3, %v5952_v57  ;;  %v2676_v57 = vrot.slane %v5158_v61, 5 }
 0x14f   : > { %v1105_v27 = vpop.f32.mrf.mxu1 }
 0x150   : > { %v5288_v23 = vadd.f32 %v3831_v0, %v1114_v50  ;;  %v1106_v8 = vadd.f32 %v1105_v27, %v5083_v33  ;;  %v1501_v63 = vpop.f32.mrf.mxu0  ;;  %v223_v33 = vld [vmem:[%s4273_s7 + $0xd4] sm:$0x1]  ;;  %s3589_s7 = sshll.u32 %s4227_s16, 11  ;;  %s5810_s16 = scalar_lea.sflag [#allocation3], %s161_s4 }
 0x151   : > { %v3798_v53 = vpop.f32.mrf.mxu1  ;;  %v2465_v31 = vshll.u32 %v223_v33, 16  ;;  %v2679_v25 = vrot.slane %v223_v33, 5  ;;  %s5800_s11 = scalar_lea.hbm %s5853_s3, %s3589_s7 }
 0x152   : > { %v5291_v56 = vadd.f32 %v1498_v12, %v1106_v8  ;;  %v1117_v47 = vadd.f32 %v3798_v53, %v5093_v17  ;;  %v3835_v6 = vpop.f32.mrf.mxu0  ;;  %4038 = vmatmul.mubr.msk.bf16.gmra.mxu0 %vm662_vm3, %v4867_v52  ;;  %v2452_v17 = vor.u32 %v2451_v44, %v2448_v40 }
 0x153   : > { %v1108_v29 = vpop.f32.mrf.mxu1  ;;  %4041 = vmatprep.mubr.msk.bf16.mxu0 %vm662_vm3, %v4878_v58  ;;  %v2462_v58 = vor.u32 %v2461_v18, %v2457_v15  ;;  %v2467_v28 = vrot.slane %v2465_v31, 5 }
 0x154   : > { %v5300_v43 = vadd.f32 %v3832_v10, %v1117_v47  ;;  %v1109_v1 = vadd.f32 %v1108_v29, %v5099_v4  ;;  %v1514_v13 = vpop.f32.mrf.mxu0  ;;  %v2678_v4 = vrot.slane %v2676_v57, 4  ;;  %v2453_v37 = vrot.slane %v2452_v17, 4  ;;  %v5966_v47 = vld [vmem:[#allocation19_spill] sm:$0xff]  ;;  %v5967_v29 = vld [vmem:[#allocation21_spill] sm:$0xff]  ;;  %v5968_v17 = vld [vmem:[#allocation24_spill] sm:$0xff] }
 0x155   : > { %v3801_v16 = vpop.f32.mrf.mxu1  ;;  %4004 = vmatmul.mubr.msk.bf16.gmra.mxu1 %vm662_vm3, %v5953_v7 }
 0x156   : > { %v5305_v59 = vadd.f32 %v1501_v63, %v1109_v1  ;;  %v1130_v52 = vadd.f32 %v3801_v16, %v5109_v48  ;;  %v3836_v61 = vpop.f32.mrf.mxu0  ;;  %4007 = vmatprep.mubr.msk.bf16.mxu1 %vm662_vm3, %v4636_v5  ;;  %v2463_v5 = vrot.slane %v2462_v58, 4  ;;  %v2680_v50 = vsel %vm4641_vm7, %v2678_v4, %v2679_v25  ;;  %v5963_v63 = vld [vmem:[#allocation28_spill] sm:$0xff] }
 0x157   : > { %v1121_v0 = vpop.f32.mrf.mxu1  ;;  %v2458_v40 = vsel %vm4318_vm4, %v2453_v37, %v2457_v15 }
 0x158   : > { %v5311_v20 = vadd.f32 %v3835_v6, %v1130_v52  ;;  %v1122_v7 = vadd.f32 %v1121_v0, %v5115_v45  ;;  %v1517_v12 = vpop.f32.mrf.mxu0  ;;  %v2677_v45 = vsel %vm4641_vm7, %v3500_v19, %v2676_v57  ;;  %v2468_v60 = vsel %vm4318_vm4, %v2463_v5, %v2467_v28  ;;  %v5969_v19 = vld [vmem:[#allocation26_spill] sm:$0xff] }
 0x159   : > { %v3802_v41 = vpop.f32.mrf.mxu1  ;;  %v3483_v15 = vcombine.low %v2458_v40, %v2468_v60  ;;  %v5971_v5 = vld [vmem:[#allocation6_spill] sm:$0xff]  ;;  %v5973_v40 = vld [vmem:[#allocation9_spill] sm:$0xff] }
 0x15a   : > { %v5314_v55 = vadd.f32 %v1514_v13, %v1122_v7  ;;  %v1133_v48 = vadd.f32 %v3802_v41, %v5125_v22  ;;  %v3839_v51 = vpop.f32.mrf.mxu0  ;;  %4042 = vmatmul.mubr.msk.bf16.gmra.mxu0 %vm662_vm3, %v4887_v2 }
 0x15b   : > { %v1124_v21 = vpop.f32.mrf.mxu1  ;;  %4045 = vmatprep.mubr.msk.bf16.mxu0 %vm662_vm3, %v4966_v11  ;;  %v5965_v11 = vld [vmem:[#allocation23_spill] sm:$0xff] }
 0x15c   : > { %v5325_v10 = vadd.f32 %v3836_v61, %v1133_v48  ;;  %v1125_v22 = vadd.f32 %v1124_v21, %v5131_v49  ;;  %v1530_v27 = vpop.f32.mrf.mxu0  ;;  %v3502_v49 = vcombine.low %v2677_v45, %v2680_v50 }
 0x15d   : > { %v3805_v8 = vpop.f32.mrf.mxu1  ;;  %4008 = vmatmul.mubr.msk.bf16.gmra.mxu1 %vm662_vm3, %v5963_v63 }
 0x15e   : > { %v5332_v44 = vadd.f32 %v1517_v12, %v1125_v22  ;;  %v1146_v53 = vadd.f32 %v3805_v8, %v5965_v11  ;;  %v3840_v18 = vpop.f32.mrf.mxu0  ;;  %4011 = vmatprep.mubr.msk.bf16.mxu1 %vm662_vm3, %v5966_v47  ;;  %v5970_v12 = vld [vmem:[#allocation11_spill] sm:$0xff] }
 0x15f   : > { %v1137_v6 = vpop.f32.mrf.mxu1  ;;  %v5972_v22 = vld [vmem:[#allocation7_spill] sm:$0xff] }
 0x160   : > { %v5339_v57 = vadd.f32 %v3839_v51, %v1146_v53  ;;  %v1138_v33 = vadd.f32 %v1137_v6, %v5967_v29  ;;  %v1533_v1 = vpop.f32.mrf.mxu0 }
 0x161   : > { %v3806_v13 = vpop.f32.mrf.mxu1 }
 0x162   : > { %v5342_v16 = vadd.f32 %v1530_v27, %v1138_v33  ;;  %v1149_v52 = vadd.f32 %v3806_v13, %v5968_v17  ;;  %v3843_v61 = vpop.f32.mrf.mxu0  ;;  %4046 = vmatmul.mubr.msk.bf16.gmra.mxu0 %vm662_vm3, %v3502_v49 }
 0x163   : > { %v1140_v58 = vpop.f32.mrf.mxu1 }
 0x164   : > { %v5346_v31 = vadd.f32 %v3840_v18, %v1149_v52  ;;  %v1141_v0 = vadd.f32 %v1140_v58, %v5969_v19  ;;  %v1546_v4 = vpop.f32.mrf.mxu0 }
 0x165   : > { %v3809_v25 = vpop.f32.mrf.mxu1  ;;  %4012 = vmatmul.mubr.msk.bf16.gmra.mxu1 %vm662_vm3, %v3483_v15 }
 0x166   : > { %v5350_v7 = vadd.f32 %v1533_v1, %v1141_v0  ;;  %v1162_v41 = vadd.f32 %v3809_v25, %v5970_v12  ;;  %v3844_v37 = vpop.f32.mrf.mxu0 }
 0x167   : > { %v1153_v48 = vpop.f32.mrf.mxu1 }
 0x168   : > { %v5353_v51 = vadd.f32 %v3843_v61, %v1162_v41  ;;  %v1154_v28 = vadd.f32 %v1153_v48, %v5971_v5  ;;  %v1549_v21 = vpop.f32.mrf.mxu0 }
 0x169   : > { %v3810_v45 = vpop.f32.mrf.mxu1 }
 0x16a   : > { %v5356_v50 = vadd.f32 %v1546_v4, %v1154_v28  ;;  %v1165_v27 = vadd.f32 %v3810_v45, %v5972_v22  ;;  %v3883_v8 = vpop.f32.mrf.mxu0 }
 0x16b   : > { %v1156_v63 = vpop.f32.mrf.mxu1 }
 0x16c   : > { %v5359_v2 = vadd.f32 %v3844_v37, %v1165_v27  ;;  %v1157_v11 = vadd.f32 %v1156_v63, %v5973_v40  ;;  %v1868_v53 = vpop.f32.mrf.mxu0 }
 0x16d   : > { %v3849_v18 = vpop.f32.mrf.mxu1 }
 0x16e   : > { %v5362_v47 = vadd.f32 %v1549_v21, %v1157_v11  ;;  %v1769_v60 = vadd.f32 %v3849_v18, %v5204_v54  ;;  %v3884_v49 = vpop.f32.mrf.mxu0 }
 0x16f   : > { %v1640_v6 = vpop.f32.mrf.mxu1 }
 0x170   : > { %v5365_v29 = vadd.f32 %v3883_v8, %v1769_v60  ;;  %v1767_v33 = vadd.f32 %v1640_v6, %v5207_v32  ;;  %v1871_v1 = vpop.f32.mrf.mxu0 }
 0x171   : > { %v3850_v13 = vpop.f32.mrf.mxu1 }
 0x172   : > { %v5368_v15 = vadd.f32 %v1868_v53, %v1767_v33  ;;  %v1770_v17 = vadd.f32 %v3850_v13, %v5214_v46  ;;  %v3887_v52 = vpop.f32.mrf.mxu0 }
 0x173   : > { %v1643_v61 = vpop.f32.mrf.mxu1 }
 0x174   : > { %v5371_v58 = vadd.f32 %v3884_v49, %v1770_v17  ;;  %v1768_v19 = vadd.f32 %v1643_v61, %v5219_v38  ;;  %v1884_v0 = vpop.f32.mrf.mxu0 }
 0x175   : > { %v3853_v54 = vpop.f32.mrf.mxu1 }
 0x176   : > { %v5374_v4 = vadd.f32 %v1871_v1, %v1768_v19  ;;  %v1773_v25 = vadd.f32 %v3853_v54, %v5224_v3  ;;  %v3888_v12 = vpop.f32.mrf.mxu0 }
 0x177   : > { %v1656_v32 = vpop.f32.mrf.mxu1 }
 0x178   : > { %v5377_v41 = vadd.f32 %v3887_v52, %v1773_v25  ;;  %v1771_v37 = vadd.f32 %v1656_v32, %v5227_v9  ;;  %v1887_v48 = vpop.f32.mrf.mxu0 }
 0x179   : > { %v3854_v46 = vpop.f32.mrf.mxu1 }
 0x17a   : > { %v5380_v5 = vadd.f32 %v1884_v0, %v1771_v37  ;;  %v1774_v28 = vadd.f32 %v3854_v46, %v5234_v36  ;;  %v3891_v21 = vpop.f32.mrf.mxu0 }
 0x17b   : > { %v1659_v38 = vpop.f32.mrf.mxu1 }
 0x17c   : > { %v5383_v45 = vadd.f32 %v3888_v12, %v1774_v28  ;;  %v1772_v22 = vadd.f32 %v1659_v38, %v5239_v14  ;;  %v1900_v27 = vpop.f32.mrf.mxu0 }
 0x17d   : > { %v3857_v3 = vpop.f32.mrf.mxu1 }
 0x17e   : > { %v5386_v8 = vadd.f32 %v1887_v48, %v1772_v22  ;;  %v1777_v63 = vadd.f32 %v3857_v3, %v5244_v42  ;;  %v3892_v40 = vpop.f32.mrf.mxu0 }
 0x17f   : > { %v1672_v9 = vpop.f32.mrf.mxu1 }
 0x180   : > { %v5389_v11 = vadd.f32 %v3891_v21, %v1777_v63  ;;  %v1775_v53 = vadd.f32 %v1672_v9, %v5247_v24  ;;  %v1903_v18 = vpop.f32.mrf.mxu0 }
 0x181   : > { %v3858_v36 = vpop.f32.mrf.mxu1 }
 0x182   : > { %v5392_v60 = vadd.f32 %v1900_v27, %v1775_v53  ;;  %v1778_v49 = vadd.f32 %v3858_v36, %v5254_v26  ;;  %v3895_v6 = vpop.f32.mrf.mxu0 }
 0x183   : > { %v1675_v14 = vpop.f32.mrf.mxu1 }
 0x184   : > { %v5395_v33 = vadd.f32 %v3892_v40, %v1778_v49  ;;  %v1776_v1 = vadd.f32 %v1675_v14, %v5259_v30  ;;  %v1916_v13 = vpop.f32.mrf.mxu0 }
 0x185   : > { %v3861_v42 = vpop.f32.mrf.mxu1 }
 0x186   : > { %v5398_v17 = vadd.f32 %v1903_v18, %v1776_v1  ;;  %v1781_v52 = vadd.f32 %v3861_v42, %v5264_v62  ;;  %v3896_v61 = vpop.f32.mrf.mxu0 }
 0x187   : > { %v1688_v24 = vpop.f32.mrf.mxu1 }
 0x188   : > { %v5401_v19 = vadd.f32 %v3895_v6, %v1781_v52  ;;  %v1779_v0 = vadd.f32 %v1688_v24, %v5267_v34  ;;  %v1919_v54 = vpop.f32.mrf.mxu0 }
 0x189   : > { %v3862_v26 = vpop.f32.mrf.mxu1 }
 0x18a   : > { %v5404_v25 = vadd.f32 %v1916_v13, %v1779_v0  ;;  %v1782_v12 = vadd.f32 %v3862_v26, %v5274_v35  ;;  %v3899_v32 = vpop.f32.mrf.mxu0 }
 0x18b   : > { %v1691_v30 = vpop.f32.mrf.mxu1 }
 0x18c   : > { %v5407_v37 = vadd.f32 %v3896_v61, %v1782_v12  ;;  %v1780_v48 = vadd.f32 %v1691_v30, %v5283_v39  ;;  %v1932_v46 = vpop.f32.mrf.mxu0 }
 0x18d   : > { %v3865_v62 = vpop.f32.mrf.mxu1 }
 0x18e   : > { %v5410_v28 = vadd.f32 %v1919_v54, %v1780_v48  ;;  %v1785_v21 = vadd.f32 %v3865_v62, %v5288_v23  ;;  %v3900_v38 = vpop.f32.mrf.mxu0 }
 0x18f   : > { %v1704_v34 = vpop.f32.mrf.mxu1 }
 0x190   : > { %v5413_v22 = vadd.f32 %v3899_v32, %v1785_v21  ;;  %v1783_v27 = vadd.f32 %v1704_v34, %v5291_v56  ;;  %v1935_v3 = vpop.f32.mrf.mxu0 }
 0x191   : > { %v3866_v35 = vpop.f32.mrf.mxu1 }
 0x192   : > { %5974 = vst [vmem:[#allocation12_spill] sm:$0xff] %v5413_v22  ;;  %v5416_v63 = vadd.f32 %v1932_v46, %v1783_v27  ;;  %v1786_v40 = vadd.f32 %v3866_v35, %v5300_v43  ;;  %v3903_v9 = vpop.f32.mrf.mxu0 }
 0x193   : > { %v1707_v39 = vpop.f32.mrf.mxu1 }
 0x194   : > { %5975 = vst [vmem:[#allocation10_spill] sm:$0xff] %v5416_v63  ;;  %v5419_v53 = vadd.f32 %v3900_v38, %v1786_v40  ;;  %v1784_v18 = vadd.f32 %v1707_v39, %v5305_v59  ;;  %v1948_v36 = vpop.f32.mrf.mxu0 }
 0x195   : > { %v3869_v23 = vpop.f32.mrf.mxu1 }
 0x196   : > { %5976 = vst [vmem:[#allocation14_spill] sm:$0xff] %v5419_v53  ;;  %v5422_v49 = vadd.f32 %v1935_v3, %v1784_v18  ;;  %v1789_v6 = vadd.f32 %v3869_v23, %v5311_v20  ;;  %v3904_v14 = vpop.f32.mrf.mxu0 }
 0x197   : > { %v1720_v56 = vpop.f32.mrf.mxu1 }
 0x198   : > { %5977 = vst [vmem:[#allocation16_spill] sm:$0xff] %v5422_v49  ;;  %v5425_v1 = vadd.f32 %v3903_v9, %v1789_v6  ;;  %v1787_v13 = vadd.f32 %v1720_v56, %v5314_v55  ;;  %v1951_v42 = vpop.f32.mrf.mxu0 }
 0x199   : > { %v3870_v43 = vpop.f32.mrf.mxu1 }
 0x19a   : > { %5978 = vst [vmem:[#allocation18_spill] sm:$0xff] %v5425_v1  ;;  %v5428_v52 = vadd.f32 %v1948_v36, %v1787_v13  ;;  %v1790_v61 = vadd.f32 %v3870_v43, %v5325_v10  ;;  %v3907_v24 = vpop.f32.mrf.mxu0 }
 0x19b   : > { %v1723_v59 = vpop.f32.mrf.mxu1 }
 0x19c   : > { %5979 = vst [vmem:[#allocation22_spill] sm:$0xff] %v5428_v52  ;;  %v5431_v0 = vadd.f32 %v3904_v14, %v1790_v61  ;;  %v1788_v54 = vadd.f32 %v1723_v59, %v5332_v44  ;;  %v1964_v26 = vpop.f32.mrf.mxu0 }
 0x19d   : > { %v3873_v20 = vpop.f32.mrf.mxu1 }
 0x19e   : > { %5980 = vst [vmem:[#allocation27_spill] sm:$0xff] %v5431_v0  ;;  %v5434_v12 = vadd.f32 %v1951_v42, %v1788_v54  ;;  %v1793_v32 = vadd.f32 %v3873_v20, %v5339_v57  ;;  %v3908_v30 = vpop.f32.mrf.mxu0 }
 0x19f   : > { %v1736_v55 = vpop.f32.mrf.mxu1 }
 0x1a0   : > { %5981 = vst [vmem:[#allocation8_spill] sm:$0xff] %v5434_v12  ;;  %v5437_v48 = vadd.f32 %v3907_v24, %v1793_v32  ;;  %v1791_v46 = vadd.f32 %v1736_v55, %v5342_v16  ;;  %v1967_v62 = vpop.f32.mrf.mxu0 }
 0x1a1   : > { %v3874_v10 = vpop.f32.mrf.mxu1 }
 0x1a2   : > { %5982 = vst [vmem:[#allocation13_spill] sm:$0xff] %v5437_v48  ;;  %v5440_v21 = vadd.f32 %v1964_v26, %v1791_v46  ;;  %v1794_v38 = vadd.f32 %v3874_v10, %v5346_v31  ;;  %v3911_v34 = vpop.f32.mrf.mxu0 }
 0x1a3   : > { %v1739_v44 = vpop.f32.mrf.mxu1 }
 0x1a4   : > { %5983 = vst [vmem:[#allocation15_spill] sm:$0xff] %v5440_v21  ;;  %v5443_v27 = vadd.f32 %v3908_v30, %v1794_v38  ;;  %v1792_v3 = vadd.f32 %v1739_v44, %v5350_v7  ;;  %v1980_v35 = vpop.f32.mrf.mxu0 }
 0x1a5   : > { %v3877_v57 = vpop.f32.mrf.mxu1 }
 0x1a6   : > { %5984 = vst [vmem:[#allocation17_spill] sm:$0xff] %v5443_v27  ;;  %v5446_v40 = vadd.f32 %v1967_v62, %v1792_v3  ;;  %v1797_v9 = vadd.f32 %v3877_v57, %v5353_v51  ;;  %v3912_v39 = vpop.f32.mrf.mxu0 }
 0x1a7   : > { %v1752_v16 = vpop.f32.mrf.mxu1 }
 0x1a8   : > { %5985 = vst [vmem:[#allocation20_spill] sm:$0xff] %v5446_v40  ;;  %v5449_v18 = vadd.f32 %v3911_v34, %v1797_v9  ;;  %v1795_v36 = vadd.f32 %v1752_v16, %v5356_v50  ;;  %v1983_v23 = vpop.f32.mrf.mxu0 }
 0x1a9   : > { %v3878_v31 = vpop.f32.mrf.mxu1 }
 0x1aa   : > { %5986 = vst [vmem:[#allocation25_spill] sm:$0xff] %v5449_v18  ;;  %v5452_v6 = vadd.f32 %v1980_v35, %v1795_v36  ;;  %v1798_v14 = vadd.f32 %v3878_v31, %v5359_v2  ;;  %v5455_v56 = vpop.f32.mrf.mxu0 }
 0x1ab   : > { %v1755_v7 = vpop.f32.mrf.mxu1 }
 0x1ac   : > { %5987 = vst [vmem:[#allocation28_spill] sm:$0xff] %v5452_v6  ;;  %v5457_v13 = vadd.f32 %v3912_v39, %v1798_v14  ;;  %v1796_v42 = vadd.f32 %v1755_v7, %v5362_v47  ;;  %v5460_v51 = vpop.f32.mrf.mxu0 }
 0x1ad   : > { %v3917_v43 = vpop.f32.mrf.mxu1 }
 0x1ae   : > { %5988 = vst [vmem:[#allocation5_spill] sm:$0xff] %v5457_v13  ;;  %v5462_v61 = vadd.f32 %v1983_v23, %v1796_v42  ;;  %v5464_v24 = vpop.f32.mrf.mxu0 }
 0x1af   : > { %v2080_v50 = vpop.f32.mrf.mxu1 }
 0x1b0   : > { %5989 = vst [vmem:[#allocation23_spill] sm:$0xff] %v5462_v61  ;;  %v5466_v59 = vpop.f32.mrf.mxu0  ;;  %v2207_v22 = vadd.f32 %v2080_v50, %v5368_v15 }
 0x1b1   : > { %v3918_v54 = vpop.f32.mrf.mxu1 }
 0x1b2   : > { %v5468_v26 = vpop.f32.mrf.mxu0 }
 0x1b3   : > { %v2083_v2 = vpop.f32.mrf.mxu1 }
 0x1b4   : > { %v5470_v20 = vpop.f32.mrf.mxu0 }
 0x1b5   : > { %v3921_v32 = vpop.f32.mrf.mxu1 }
 0x1b6   : > { %v5472_v30 = vpop.f32.mrf.mxu0 }
 0x1b7   : > { %v2096_v47 = vpop.f32.mrf.mxu1 }
 0x1b8   : > { %v5474_v55 = vpop.f32.mrf.mxu0 }
 0x1b9   : > { %v3922_v46 = vpop.f32.mrf.mxu1 }
 0x1ba   : > { %v5476_v62 = vpop.f32.mrf.mxu0 }
 0x1bb   : > { %v2099_v10 = vpop.f32.mrf.mxu1 }
 0x1bc   : > { %v5478_v38 = vpop.f32.mrf.mxu0 }
 0x1bd   : > { %v3925_v34 = vpop.f32.mrf.mxu1 }
 0x1be   : > { %v5480_v44 = vpop.f32.mrf.mxu0  ;;  %v2217_v15 = vadd.f32 %v3925_v34, %v5389_v11  ;;  %v6016_v34 = vld [vmem:[#allocation18_spill] sm:$0xff] }
 0x1bf   : > { %v2112_v3 = vpop.f32.mrf.mxu1 }
 0x1c0   : > { %v5482_v35 = vpop.f32.mrf.mxu0 }
 0x1c1   : > { %5990 = vst [vmem:[#allocation19_spill] sm:$0xff] %v5482_v35  ;;  %v3926_v57 = vpop.f32.mrf.mxu1 }
 0x1c2   : > { %v5484_v9 = vpop.f32.mrf.mxu0 }
 0x1c3   : > { %5991 = vst [vmem:[#allocation21_spill] sm:$0xff] %v5484_v9  ;;  %v2115_v39 = vpop.f32.mrf.mxu1  ;;  %v2208_v9 = vadd.f32 %v2083_v2, %v5374_v4 }
 0x1c4   : > { %v5486_v16 = vpop.f32.mrf.mxu0 }
 0x1c5   : > { %5992 = vst [vmem:[#allocation24_spill] sm:$0xff] %v5486_v16  ;;  %v3929_v36 = vpop.f32.mrf.mxu1  ;;  %v5549_v11 = vadd.f32 %v5466_v59, %v2208_v9 }
 0x1c6   : > { %v5488_v23 = vpop.f32.mrf.mxu0 }
 0x1c7   : > { %5993 = vst [vmem:[#allocation26_spill] sm:$0xff] %v5488_v23  ;;  %v2128_v31 = vpop.f32.mrf.mxu1 }
 0x1c8   : > { %v5490_v14 = vpop.f32.mrf.mxu0 }
 0x1c9   : > { %5994 = vst [vmem:[#allocation11_spill] sm:$0xff] %v5490_v14  ;;  %v3930_v7 = vpop.f32.mrf.mxu1 }
 0x1ca   : > { %v5492_v42 = vpop.f32.mrf.mxu0 }
 0x1cb   : > { %5995 = vst [vmem:[#allocation6_spill] sm:$0xff] %v5492_v42  ;;  %v2131_v61 = vpop.f32.mrf.mxu1 }
 0x1cc   : > { %v5494_v13 = vpop.f32.mrf.mxu0 }
 0x1cd   : > { %5996 = vst [vmem:[#allocation7_spill] sm:$0xff] %v5494_v13  ;;  %v3933_v6 = vpop.f32.mrf.mxu1 }
 0x1ce   : > { %v5496_v18 = vpop.f32.mrf.mxu0 }
 0x1cf   : > { %5997 = vst [vmem:[#allocation9_spill] sm:$0xff] %v5496_v18  ;;  %v2144_v40 = vpop.f32.mrf.mxu1 }
 0x1d0   : > { %v5498_v27 = vpop.f32.mrf.mxu0 }
 0x1d1   : > { %5998 = vst [vmem:[#allocation29_spill] sm:$0xff] %v5498_v27  ;;  %v3934_v21 = vpop.f32.mrf.mxu1 }
 0x1d2   : > { %v5500_v48 = vpop.f32.mrf.mxu0 }
 0x1d3   : > { %5999 = vst [vmem:[#allocation30_spill] sm:$0xff] %v5500_v48  ;;  %v2147_v12 = vpop.f32.mrf.mxu1 }
 0x1d4   : > { %v5502_v0 = vpop.f32.mrf.mxu0 }
 0x1d5   : > { %6000 = vst [vmem:[#allocation31_spill] sm:$0xff] %v5502_v0  ;;  %v3937_v52 = vpop.f32.mrf.mxu1 }
 0x1d6   : > { %v5504_v14 = vpop.f32.mrf.mxu0 }
 0x1d7   : > { %6001 = vst [vmem:[#allocation32_spill] sm:$0xff] %v5504_v14  ;;  %v2160_v23 = vpop.f32.mrf.mxu1 }
 0x1d8   : > { %v5506_v42 = vpop.f32.mrf.mxu0 }
 0x1d9   : > { %6002 = vst [vmem:[#allocation33_spill] sm:$0xff] %v5506_v42  ;;  %v3938_v1 = vpop.f32.mrf.mxu1  ;;  %v2209_v42 = vadd.f32 %v3917_v43, %v5365_v29  ;;  %v2212_v29 = vadd.f32 %v2099_v10, %v5386_v8  ;;  %v2215_v43 = vadd.f32 %v2112_v3, %v5392_v60  ;;  %v6015_v10 = vld [vmem:[#allocation16_spill] sm:$0xff] }
 0x1da   : > { %v5508_v13 = vpop.f32.mrf.mxu0 }
 0x1db   : > { %6003 = vst [vmem:[#allocation34_spill] sm:$0xff] %v5508_v13  ;;  %v2163_v49 = vpop.f32.mrf.mxu1  ;;  %v2415_v4 = vadd.f32 %v5455_v56, %v2209_v42  ;;  %v6020_v42 = vld [vmem:[#allocation27_spill] sm:$0xff] }
 0x1dc   : > { %v5510_v18 = vpop.f32.mrf.mxu0 }
 0x1dd   : > { %6004 = vst [vmem:[#allocation35_spill] sm:$0xff] %v5510_v18  ;;  %v3941_v53 = vpop.f32.mrf.mxu1  ;;  %v2210_v18 = vadd.f32 %v3918_v54, %v5371_v58  ;;  %v2218_v58 = vadd.f32 %v3926_v57, %v5395_v33  ;;  %v2219_v33 = vadd.f32 %v2128_v31, %v5404_v25  ;;  %v5572_v25 = vadd.f32 %v5478_v38, %v2215_v43  ;;  %v6017_v57 = vld [vmem:[#allocation26_spill] sm:$0xff] }
 0x1de   : > { %v5512_v27 = vpop.f32.mrf.mxu0  ;;  %v2224_v38 = vadd.f32 %v2147_v12, %v6015_v10  ;;  %v6023_v12 = vld [vmem:[#allocation15_spill] sm:$0xff] }
 0x1df   : > { %6005 = vst [vmem:[#allocation36_spill] sm:$0xff] %v5512_v27  ;;  %v2176_v16 = vpop.f32.mrf.mxu1  ;;  %v2213_v27 = vadd.f32 %v3921_v32, %v5377_v41  ;;  %v2413_v41 = vadd.f32 %v5460_v51, %v2207_v22  ;;  %v2416_v8 = vadd.f32 %v5464_v24, %v2210_v18  ;;  %v2220_v18 = vadd.f32 %v2131_v61, %v5410_v28  ;;  %v6011_v61 = vld [vmem:[#allocation12_spill] sm:$0xff] }
 0x1e0   : > { %v5514_v48 = vpop.f32.mrf.mxu0  ;;  %v5566_v51 = vadd.f32 %v5474_v55, %v2212_v29  ;;  %v2230_v29 = vadd.f32 %v3938_v1, %v6020_v42 }
 0x1e1   : > { %6006 = vst [vmem:[#allocation37_spill] sm:$0xff] %v5514_v48  ;;  %v5516_v63 = vpop.f32.mrf.mxu1  ;;  %v2211_v48 = vadd.f32 %v2096_v47, %v5380_v5  ;;  %v2216_v5 = vadd.f32 %v2115_v39, %v5398_v17  ;;  %v5552_v60 = vadd.f32 %v5468_v26, %v2213_v27  ;;  %v5569_v27 = vadd.f32 %v5476_v62, %v2217_v15  ;;  %v6013_v47 = vld [vmem:[#allocation24_spill] sm:$0xff]  ;;  %v6018_v39 = vld [vmem:[#allocation11_spill] sm:$0xff] }
 0x1e2   : > { %6007 = vst [vmem:[#allocation38_spill] sm:$0xff] %v5516_v63  ;;  %v5518_v0 = vpop.f32.mrf.mxu0  ;;  %v2225_v26 = vadd.f32 %v3933_v6, %v6011_v61  ;;  %v5588_v55 = vadd.f32 %v6013_v47, %v2219_v33  ;;  %v6019_v6 = vld [vmem:[#allocation22_spill] sm:$0xff]  ;;  %v6021_v15 = vld [vmem:[#allocation8_spill] sm:$0xff]  ;;  %v6029_v47 = vld [vmem:[#allocation17_spill] sm:$0xff] }
 0x1e3   : > { %6008 = vst [vmem:[#allocation39_spill] sm:$0xff] %v5518_v0  ;;  %v5520_v14 = vpop.f32.mrf.mxu1  ;;  %v2214_v0 = vadd.f32 %v3922_v46, %v5383_v45  ;;  %v2221_v45 = vadd.f32 %v3929_v36, %v5401_v19  ;;  %v5558_v22 = vadd.f32 %v5470_v20, %v2211_v48  ;;  %v2222_v19 = vadd.f32 %v3930_v7, %v5407_v37  ;;  %v6010_v37 = vld [vmem:[#allocation21_spill] sm:$0xff]  ;;  %v6012_v20 = vld [vmem:[#allocation10_spill] sm:$0xff] }
 0x1e4   : > { %v5524_v13 = vpop.f32.mrf.mxu0  ;;  %v5575_v48 = vadd.f32 %v5480_v44, %v2218_v58  ;;  %v2223_v32 = vadd.f32 %v2144_v40, %v6012_v20  ;;  %v6014_v46 = vld [vmem:[#allocation14_spill] sm:$0xff]  ;;  %v2229_v44 = vadd.f32 %v3937_v52, %v6016_v34  ;;  %v5597_v36 = vadd.f32 %v6018_v39, %v2220_v18  ;;  %v6031_v34 = vld [vmem:[#allocation31_spill] sm:$0xff]  ;;  %v6033_v39 = vld [vmem:[#allocation33_spill] sm:$0xff] }
 0x1e5   : > { %v5529_v35 = vpop.f32.mrf.mxu1  ;;  %v5561_v17 = vadd.f32 %v5472_v30, %v2214_v0  ;;  %v6009_v0 = vld [vmem:[#allocation19_spill] sm:$0xff]  ;;  %v5583_v28 = vadd.f32 %v6010_v37, %v2221_v45  ;;  %v2226_v62 = vadd.f32 %v3934_v21, %v6014_v46  ;;  %v5594_v9 = vadd.f32 %v6017_v57, %v2222_v19  ;;  %v6022_v21 = vld [vmem:[#allocation13_spill] sm:$0xff]  ;;  %v6024_v33 = vld [vmem:[#allocation6_spill] sm:$0xff] }
 0x1e6   : > { %v5533_v63 = vpop.f32.mrf.mxu0  ;;  %v5580_v59 = vadd.f32 %v6009_v0, %v2216_v5  ;;  %v2227_v31 = vadd.f32 %v2160_v23, %v6019_v6  ;;  %v2228_v43 = vadd.f32 %v2163_v49, %v6021_v15  ;;  %v2233_v58 = vadd.f32 %v3941_v53, %v6022_v21  ;;  %v5607_v5 = vld [vmem:[%s5852_s2] ss:$0 sm:$0xff]  ;;  %v6025_v23 = vld [vmem:[#allocation7_spill] sm:$0xff]  ;;  %v6028_v61 = vld [vmem:[#allocation30_spill] sm:$0xff] }
 0x1e7   : > { %v5539_v50 = vpop.f32.mrf.mxu1  ;;  %v2231_v52 = vadd.f32 %v2176_v16, %v6023_v12  ;;  %v5610_v19 = vadd.f32 %v6024_v33, %v2225_v26  ;;  %v6026_v53 = vld [vmem:[#allocation9_spill] sm:$0xff]  ;;  %v5622_v20 = vadd.f32 %v6028_v61, %v2229_v44  ;;  %v6032_v57 = vld [vmem:[#allocation32_spill] sm:$0xff]  ;;  %v6034_v6 = vld [vmem:[#allocation34_spill] sm:$0xff] }
 0x1e8   : > { %v5545_v54 = vpop.f32.mrf.mxu0  ;;  %v5616_v0 = vadd.f32 %v6026_v53, %v2226_v62  ;;  %v6027_v16 = vld [vmem:[#allocation29_spill] sm:$0xff]  ;;  %v5635_v44 = vadd.f32 %v6033_v39, %v2228_v43  ;;  %v6035_v42 = vld [vmem:[#allocation35_spill] sm:$0xff]  ;;  %v6039_v61 = vld [vmem:[#allocation28_spill] sm:$0xff] }
 0x1e9   : > { %v5555_v2 = vpop.f32.mrf.mxu1  ;;  %v5619_v37 = vadd.f32 %v6027_v16, %v2224_v38  ;;  %v6030_v46 = vld [vmem:[#allocation38_spill] sm:$0xff]  ;;  %v5632_v38 = vadd.f32 %v6032_v57, %v2230_v29  ;;  %v5641_v15 = vadd.f32 %v6035_v42, %v2231_v52  ;;  %v6037_v29 = vld [vmem:[#allocation20_spill] sm:$0xff]  ;;  %v6040_v42 = vld [vmem:[#allocation37_spill] sm:$0xff] }
 0x1ea   : > { %v4019_v56 = vpop.f32.mrf.mxu0  ;;  %v2234_v26 = vadd.f32 %v6030_v46, %v6029_v47  ;;  %v2232_v43 = vadd.f32 %v5520_v14, %v6037_v29  ;;  %v2235_v47 = vadd.f32 %v5539_v50, %v6039_v61 }
 0x1eb   : > { %v5577_v24 = vpop.f32.mrf.mxu1 }
 0x1ec   : > { %v2726_v30 = vpop.f32.mrf.mxu0 }
 0x1ed   : > { %v3985_v3 = vpop.f32.mrf.mxu1 }
 0x1ee   : > { %v2643_v40 = vadd.f32 %v3985_v3, %v2415_v4  ;;  %v4020_v7 = vpop.f32.mrf.mxu0  ;;  %v5613_v4 = vadd.f32 %v6025_v23, %v2223_v32  ;;  %v5627_v32 = vadd.f32 %v6031_v34, %v2227_v31  ;;  %v6038_v23 = vld [vmem:[#allocation25_spill] sm:$0xff] }
 0x1ef   : > { %v2514_v45 = vpop.f32.mrf.mxu1 }
 0x1f0   : > { %v2855_v1 = vadd.f32 %v4019_v56, %v2643_v40  ;;  %v2641_v49 = vadd.f32 %v2514_v45, %v2413_v41  ;;  %v2729_v18 = vpop.f32.mrf.mxu0  ;;  %v5638_v40 = vadd.f32 %v6034_v6, %v2233_v58  ;;  %v6036_v45 = vld [vmem:[#allocation36_spill] sm:$0xff]  ;;  %v2237_v58 = vadd.f32 %v5529_v35, %v6038_v23  ;;  %v6041_v23 = vld [vmem:[#allocation39_spill] sm:$0xff] }
 0x1f1   : > { %v3986_v10 = vpop.f32.mrf.mxu1  ;;  %v5645_v33 = vadd.f32 %v6036_v45, %v2234_v26 }
 0x1f2   : > { %v2894_v41 = vadd.f32 %v5607_v5, %v2855_v1  ;;  %v2853_v56 = vadd.f32 %v2726_v30, %v2641_v49  ;;  %v2644_v62 = vadd.f32 %v3986_v10, %v2416_v8  ;;  %v4023_v3 = vpop.f32.mrf.mxu0 }
 0x1f3   : > { %v2517_v31 = vpop.f32.mrf.mxu1 }
 0x1f4   : > { %vm2926_vm9 = vcmp.ge.f32.partialorder %v2894_v41, 0.0  ;;  %v2958_v21 = vmul.f32 0.2, %v2894_v41  ;;  %v2892_v30 = vadd.f32 %v5607_v5, %v2853_v56  ;;  %v2856_v12 = vadd.f32 %v4020_v7, %v2644_v62  ;;  %v2742_v8 = vpop.f32.mrf.mxu0 }
 0x1f5   : > { %v2642_v52 = vadd.f32 %v2517_v31, %v5549_v11  ;;  %v3989_v1 = vpop.f32.mrf.mxu1  ;;  %v5661_v31 = vadd.f32 %v6040_v42, %v2232_v43 }
 0x1f6   : > { %v2990_v49 = vsel %vm2926_vm9, %v2894_v41, %v2958_v21  ;;  %vm2924_vm10 = vcmp.ge.f32.partialorder %v2892_v30, 0.0  ;;  %v2956_v53 = vmul.f32 0.2, %v2892_v30  ;;  %v2895_v7 = vadd.f32 %v5607_v5, %v2856_v12  ;;  %v4024_v16 = vpop.f32.mrf.mxu0 }
 0x1f7   : > { %v3022_v46 = vmul.f32 1.4142135, %v2990_v49  ;;  %v2854_v26 = vadd.f32 %v2729_v18, %v2642_v52  ;;  %v2647_v14 = vadd.f32 %v3989_v1, %v5552_v60  ;;  %v2530_v10 = vpop.f32.mrf.mxu1  ;;  %v5672_v52 = vadd.f32 %v6041_v23, %v2237_v58 }
 0x1f8   : > { %v2988_v35 = vsel %vm2924_vm10, %v2892_v30, %v2956_v53  ;;  %vm2927_vm11 = vcmp.ge.f32.partialorder %v2895_v7, 0.0  ;;  %v2959_v34 = vmul.f32 0.2, %v2895_v7  ;;  %v2645_v11 = vadd.f32 %v2530_v10, %v5558_v22  ;;  %v2745_v56 = vpop.f32.mrf.mxu0 }
 0x1f9   : > { %v3559_v41 = vpack.c.bf16 %v3022_v46, %v3022_v46  ;;  %v3020_v62 = vmul.f32 1.4142135, %v2988_v35  ;;  %v2893_v57 = vadd.f32 %v5607_v5, %v2854_v26  ;;  %v2859_v39 = vadd.f32 %v4023_v3, %v2647_v14  ;;  %v3990_v6 = vpop.f32.mrf.mxu1  ;;  %v6042_v14 = vld [vmem:[#allocation5_spill] sm:$0xff] }
 0x1fa   : > { %v2991_v50 = vsel %vm2927_vm11, %v2895_v7, %v2959_v34  ;;  %v2857_v18 = vadd.f32 %v2742_v8, %v2645_v11  ;;  %v2648_v60 = vadd.f32 %v3990_v6, %v5561_v17  ;;  %v4027_v21 = vpop.f32.mrf.mxu0  ;;  %v5675_v1 = vadd.f32 %v5524_v13, %v2235_v47 }
 0x1fb   : > { %3183 = vst.msk [vmem:[%s5664_s6 + $0x8] sm:$0xf] %vm3180_vm8, %v3559_v41  ;;  %v3557_v22 = vpack.c.bf16 %v3020_v62, %v3020_v62  ;;  %v3023_v30 = vmul.f32 1.4142135, %v2991_v50  ;;  %vm2925_vm12 = vcmp.ge.f32.partialorder %v2893_v57, 0.0  ;;  %v2533_v3 = vpop.f32.mrf.mxu1  ;;  %v2898_v45 = vadd.f32 %v5607_v5, %v2859_v39 }
 0x1fc   : > { %v2957_v12 = vmul.f32 0.2, %v2893_v57  ;;  %v2896_v29 = vadd.f32 %v5607_v5, %v2857_v18  ;;  %v2860_v8 = vadd.f32 %v4024_v16, %v2648_v60  ;;  %v2646_v17 = vadd.f32 %v2533_v3, %v5566_v51  ;;  %v2758_v43 = vpop.f32.mrf.mxu0 }
 0x1fd   : > { %3181 = vst.msk [vmem:[%s5664_s6] sm:$0xf] %vm3180_vm8, %v3557_v22  ;;  %v3560_v49 = vpack.c.bf16 %v3023_v30, %v3023_v30  ;;  %v3993_v7 = vpop.f32.mrf.mxu1  ;;  %vm2930_vm13 = vcmp.ge.f32.partialorder %v2898_v45, 0.0  ;;  %v2962_v46 = vmul.f32 0.2, %v2898_v45  ;;  %v2238_v10 = vadd.f32 %v5555_v2, %v6042_v14  ;;  %v6043_v2 = vld [vmem:[#allocation23_spill] sm:$0xff] }
 0x1fe   : > { %v2989_v53 = vsel %vm2925_vm12, %v2893_v57, %v2957_v12  ;;  %vm2928_vm14 = vcmp.ge.f32.partialorder %v2896_v29, 0.0  ;;  %v4028_v26 = vpop.f32.mrf.mxu0  ;;  %v2960_v51 = vmul.f32 0.2, %v2896_v29  ;;  %v2899_v58 = vadd.f32 %v5607_v5, %v2860_v8 }
 0x1ff   : > { %v3021_v61 = vmul.f32 1.4142135, %v2989_v53  ;;  %3184 = vst.msk [vmem:[%s5664_s6 + $0xc] sm:$0xf] %vm3180_vm8, %v3560_v49  ;;  %v2858_v16 = vadd.f32 %v2745_v56, %v2646_v17  ;;  %v2651_v13 = vadd.f32 %v3993_v7, %v5569_v27  ;;  %v2546_v47 = vpop.f32.mrf.mxu1  ;;  %v2994_v34 = vsel %vm2930_vm13, %v2898_v45, %v2962_v46 }
 0x200   : > { %v2649_v11 = vadd.f32 %v2546_v47, %v5572_v25  ;;  %v2761_v41 = vpop.f32.mrf.mxu0  ;;  %v3026_v62 = vmul.f32 1.4142135, %v2994_v34  ;;  %v2992_v57 = vsel %vm2928_vm14, %v2896_v29, %v2960_v51  ;;  %vm2931_vm15 = vcmp.ge.f32.partialorder %v2899_v58, 0.0 }
 0x201   : > { %v3558_v35 = vpack.c.bf16 %v3021_v61, %v3021_v61  ;;  %v2963_v39 = vmul.f32 0.2, %v2899_v58  ;;  %v3994_v6 = vpop.f32.mrf.mxu1  ;;  %v3024_v56 = vmul.f32 1.4142135, %v2992_v57  ;;  %v2897_v27 = vadd.f32 %v5607_v5, %v2858_v16 }
 0x202   : > { %v2863_v42 = vadd.f32 %v4027_v21, %v2651_v13  ;;  %v2861_v50 = vadd.f32 %v2758_v43, %v2649_v11  ;;  %v4031_v18 = vpop.f32.mrf.mxu0  ;;  %v2236_v60 = vadd.f32 %v5577_v24, %v6043_v2  ;;  %v3563_v22 = vpack.c.bf16 %v3026_v62, %v3026_v62 }
 0x203   : > { %3182 = vst.msk [vmem:[%s5664_s6 + $0x4] sm:$0xf] %vm3180_vm8, %v3558_v35  ;;  %v2995_v25 = vsel %vm2931_vm15, %v2899_v58, %v2963_v39  ;;  %v2652_v30 = vadd.f32 %v3994_v6, %v5575_v48  ;;  %v2549_v12 = vpop.f32.mrf.mxu1  ;;  %v3561_v3 = vpack.c.bf16 %v3024_v56, %v3024_v56  ;;  %vm2929_vm0 = vcmp.ge.f32.partialorder %v2897_v27, 0.0 }
 0x204   : > { %v3027_v45 = vmul.f32 1.4142135, %v2995_v25  ;;  %v2961_v29 = vmul.f32 0.2, %v2897_v27  ;;  %v2774_v8 = vpop.f32.mrf.mxu0  ;;  %3187 = vst.msk [vmem:[%s5664_s6 + $0x18] sm:$0xf] %vm3180_vm8, %v3563_v22  ;;  %v2902_v21 = vadd.f32 %v5607_v5, %v2863_v42  ;;  %v2900_v17 = vadd.f32 %v5607_v5, %v2861_v50 }
 0x205   : > { %v2864_v43 = vadd.f32 %v4028_v26, %v2652_v30  ;;  %v2650_v24 = vadd.f32 %v2549_v12, %v5580_v59  ;;  %v3997_v23 = vpop.f32.mrf.mxu1  ;;  %v5698_v49 = vadd.f32 %v5533_v63, %v2238_v10  ;;  %3185 = vst.msk [vmem:[%s5664_s6 + $0x10] sm:$0xf] %vm3180_vm8, %v3561_v3  ;;  %v5707_v47 = vadd.f32 %v5545_v54, %v2236_v60 }
 0x206   : > { %v3564_v48 = vpack.c.bf16 %v3027_v45, %v3027_v45  ;;  %v2993_v53 = vsel %vm2929_vm0, %v2897_v27, %v2961_v29  ;;  %v2655_v7 = vadd.f32 %v3997_v23, %v5583_v28  ;;  %v4032_v61 = vpop.f32.mrf.mxu0  ;;  %vm2934_vm1 = vcmp.ge.f32.partialorder %v2902_v21, 0.0 }
 0x207   : > { %v3025_v46 = vmul.f32 1.4142135, %v2993_v53  ;;  %v2966_v51 = vmul.f32 0.2, %v2902_v21  ;;  %vm2932_vm2 = vcmp.ge.f32.partialorder %v2900_v17, 0.0  ;;  %v2562_v58 = vpop.f32.mrf.mxu1  ;;  %v2903_v26 = vadd.f32 %v5607_v5, %v2864_v43 }
 0x208   : > { %3188 = vst.msk [vmem:[%s5664_s6 + $0x1c] sm:$0xf] %vm3180_vm8, %v3564_v48  ;;  %v2964_v59 = vmul.f32 0.2, %v2900_v17  ;;  %v2862_v63 = vadd.f32 %v2761_v41, %v2650_v24  ;;  %v2867_v16 = vadd.f32 %v4031_v18, %v2655_v7  ;;  %v2777_v13 = vpop.f32.mrf.mxu0  ;;  %v2653_v10 = vadd.f32 %v2562_v58, %v5588_v55 }
 0x209   : > { %v3562_v14 = vpack.c.bf16 %v3025_v46, %v3025_v46  ;;  %v2998_v28 = vsel %vm2934_vm1, %v2902_v21, %v2966_v51  ;;  %v3998_v35 = vpop.f32.mrf.mxu1  ;;  %vm2935_vm3 = vcmp.ge.f32.partialorder %v2903_v26, 0.0  ;;  %v2967_v62 = vmul.f32 0.2, %v2903_v26 }
 0x20a   : > { %v3030_v34 = vmul.f32 1.4142135, %v2998_v28  ;;  %v2996_v11 = vsel %vm2932_vm2, %v2900_v17, %v2964_v59  ;;  %v4035_v57 = vpop.f32.mrf.mxu0  ;;  %v2901_v41 = vadd.f32 %v5607_v5, %v2862_v63  ;;  %v2906_v6 = vadd.f32 %v5607_v5, %v2867_v16 }
 0x20b   : > { %3186 = vst.msk [vmem:[%s5664_s6 + $0x14] sm:$0xf] %vm3180_vm8, %v3562_v14  ;;  %v3028_v39 = vmul.f32 1.4142135, %v2996_v11  ;;  %v2865_v54 = vadd.f32 %v2774_v8, %v2653_v10  ;;  %v2565_v56 = vpop.f32.mrf.mxu1  ;;  %v2999_v42 = vsel %vm2935_vm3, %v2903_v26, %v2967_v62  ;;  %v2656_v55 = vadd.f32 %v3998_v35, %v5594_v9 }
 0x20c   : > { %v3567_v27 = vpack.c.bf16 %v3030_v34, %v3030_v34  ;;  %v2654_v50 = vadd.f32 %v2565_v56, %v5597_v36  ;;  %v2790_v18 = vpop.f32.mrf.mxu0  ;;  %v3031_v60 = vmul.f32 1.4142135, %v2999_v42  ;;  %vm2933_vm4 = vcmp.ge.f32.partialorder %v2901_v41, 0.0 }
 0x20d   : > { %v3565_v2 = vpack.c.bf16 %v3028_v39, %v3028_v39  ;;  %v2965_v22 = vmul.f32 0.2, %v2901_v41  ;;  %v4001_v25 = vpop.f32.mrf.mxu1  ;;  %vm2938_vm5 = vcmp.ge.f32.partialorder %v2906_v6, 0.0  ;;  %v2970_v30 = vmul.f32 0.2, %v2906_v6 }
 0x20e   : > { %3191 = vst.msk [vmem:[%s5664_s6 + $0x28] sm:$0xf] %vm3180_vm8, %v3567_v27  ;;  %v2904_v12 = vadd.f32 %v5607_v5, %v2865_v54  ;;  %v2868_v3 = vadd.f32 %v4032_v61, %v2656_v55  ;;  %v4036_v45 = vpop.f32.mrf.mxu0  ;;  %v3568_v9 = vpack.c.bf16 %v3031_v60, %v3031_v60  ;;  %v2866_v36 = vadd.f32 %v2777_v13, %v2654_v50 }
 0x20f   : > { %3189 = vst.msk [vmem:[%s5664_s6 + $0x20] sm:$0xf] %vm3180_vm8, %v3565_v2  ;;  %v2997_v29 = vsel %vm2933_vm4, %v2901_v41, %v2965_v22  ;;  %v2659_v8 = vadd.f32 %v4001_v25, %v5610_v19  ;;  %v2578_v21 = vpop.f32.mrf.mxu1  ;;  %v3002_v43 = vsel %vm2938_vm5, %v2906_v6, %v2970_v30 }
 0x210   : > { %v3029_v17 = vmul.f32 1.4142135, %v2997_v29  ;;  %vm2936_vm6 = vcmp.ge.f32.partialorder %v2904_v12, 0.0  ;;  %v2968_v24 = vmul.f32 0.2, %v2904_v12  ;;  %v2793_v23 = vpop.f32.mrf.mxu0  ;;  %v2907_v53 = vadd.f32 %v5607_v5, %v2868_v3 }
 0x211   : > { %3192 = vst.msk [vmem:[%s5664_s6 + $0x2c] sm:$0xf] %vm3180_vm8, %v3568_v9  ;;  %v3034_v48 = vmul.f32 1.4142135, %v3002_v43  ;;  %v2905_v7 = vadd.f32 %v5607_v5, %v2866_v36  ;;  %v2871_v61 = vadd.f32 %v4035_v57, %v2659_v8  ;;  %v4002_v46 = vpop.f32.mrf.mxu1  ;;  %v2657_v19 = vadd.f32 %v2578_v21, %v5613_v4 }
 0x212   : > { %v3566_v51 = vpack.c.bf16 %v3029_v17, %v3029_v17  ;;  %v3000_v58 = vsel %vm2936_vm6, %v2904_v12, %v2968_v24  ;;  %v2660_v59 = vadd.f32 %v4002_v46, %v5616_v0  ;;  %v4039_v26 = vpop.f32.mrf.mxu0  ;;  %vm2939_vm7 = vcmp.ge.f32.partialorder %v2907_v53, 0.0 }
 0x213   : > { %v3571_v63 = vpack.c.bf16 %v3034_v48, %v3034_v48  ;;  %v3032_v16 = vmul.f32 1.4142135, %v3000_v58  ;;  %v2971_v13 = vmul.f32 0.2, %v2907_v53  ;;  %v2581_v14 = vpop.f32.mrf.mxu1  ;;  %vm2937_vm9 = vcmp.ge.f32.partialorder %v2905_v7, 0.0 }
 0x214   : > { %3190 = vst.msk [vmem:[%s5664_s6 + $0x24] sm:$0xf] %vm3180_vm8, %v3566_v51  ;;  %v2969_v28 = vmul.f32 0.2, %v2905_v7  ;;  %v2910_v10 = vadd.f32 %v5607_v5, %v2871_v61  ;;  %v2869_v35 = vadd.f32 %v2790_v18, %v2657_v19  ;;  %v2806_v34 = vpop.f32.mrf.mxu0  ;;  %v2872_v0 = vadd.f32 %v4036_v45, %v2660_v59 }
 0x215   : > { %3195 = vst.msk [vmem:[%s5664_s6 + $0x38] sm:$0xf] %vm3180_vm8, %v3571_v63  ;;  %v3569_v4 = vpack.c.bf16 %v3032_v16, %v3032_v16  ;;  %v3003_v11 = vsel %vm2939_vm7, %v2907_v53, %v2971_v13  ;;  %v2658_v62 = vadd.f32 %v2581_v14, %v5619_v37  ;;  %v4005_v57 = vpop.f32.mrf.mxu1 }
 0x216   : > { %v3035_v39 = vmul.f32 1.4142135, %v3003_v11  ;;  %v3001_v41 = vsel %vm2937_vm9, %v2905_v7, %v2969_v28  ;;  %vm2942_vm10 = vcmp.ge.f32.partialorder %v2910_v10, 0.0  ;;  %v2974_v6 = vmul.f32 0.2, %v2910_v10  ;;  %v4040_v54 = vpop.f32.mrf.mxu0 }
 0x217   : > { %3193 = vst.msk [vmem:[%s5664_s6 + $0x30] sm:$0xf] %vm3180_vm8, %v3569_v4  ;;  %v3033_v56 = vmul.f32 1.4142135, %v3001_v41  ;;  %v2908_v27 = vadd.f32 %v5607_v5, %v2869_v35  ;;  %v2911_v42 = vadd.f32 %v5607_v5, %v2872_v0  ;;  %v2870_v55 = vadd.f32 %v2793_v23, %v2658_v62  ;;  %v2594_v50 = vpop.f32.mrf.mxu1 }
 0x218   : > { %v3572_v18 = vpack.c.bf16 %v3035_v39, %v3035_v39  ;;  %v3006_v2 = vsel %vm2942_vm10, %v2910_v10, %v2974_v6  ;;  %v2663_v37 = vadd.f32 %v4005_v57, %v5622_v20  ;;  %v2661_v60 = vadd.f32 %v2594_v50, %v5627_v32  ;;  %v2809_v22 = vpop.f32.mrf.mxu0 }
 0x219   : > { %v3570_v25 = vpack.c.bf16 %v3033_v56, %v3033_v56  ;;  %v3038_v30 = vmul.f32 1.4142135, %v3006_v2  ;;  %vm2940_vm11 = vcmp.ge.f32.partialorder %v2908_v27, 0.0  ;;  %v2972_v12 = vmul.f32 0.2, %v2908_v27  ;;  %v4006_v3 = vpop.f32.mrf.mxu1 }
 0x21a   : > { %3196 = vst.msk [vmem:[%s5664_s6 + $0x3c] sm:$0xf] %vm3180_vm8, %v3572_v18  ;;  %vm2943_vm12 = vcmp.ge.f32.partialorder %v2911_v42, 0.0  ;;  %v2975_v45 = vmul.f32 0.2, %v2911_v42  ;;  %v2909_v9 = vadd.f32 %v5607_v5, %v2870_v55  ;;  %v2875_v29 = vadd.f32 %v4039_v26, %v2663_v37  ;;  %v4043_v36 = vpop.f32.mrf.mxu0 }
 0x21b   : > { %3194 = vst.msk [vmem:[%s5664_s6 + $0x34] sm:$0xf] %vm3180_vm8, %v3570_v25  ;;  %v3575_v20 = vpack.c.bf16 %v3038_v30, %v3038_v30  ;;  %v3004_v8 = vsel %vm2940_vm11, %v2908_v27, %v2972_v12  ;;  %v2873_v32 = vadd.f32 %v2806_v34, %v2661_v60  ;;  %v2664_v21 = vadd.f32 %v4006_v3, %v5632_v38  ;;  %v2597_v17 = vpop.f32.mrf.mxu1 }
 0x21c   : > { %v3036_v43 = vmul.f32 1.4142135, %v3004_v8  ;;  %v3007_v24 = vsel %vm2943_vm12, %v2911_v42, %v2975_v45  ;;  %vm2941_vm13 = vcmp.ge.f32.partialorder %v2909_v9, 0.0  ;;  %v2973_v23 = vmul.f32 0.2, %v2909_v9  ;;  %v2822_v48 = vpop.f32.mrf.mxu0 }
 0x21d   : > { %3199 = vst.msk [vmem:[%s5664_s6 + $0x48] sm:$0xf] %vm3180_vm8, %v3575_v20  ;;  %v3039_v53 = vmul.f32 1.4142135, %v3007_v24  ;;  %v2914_v7 = vadd.f32 %v5607_v5, %v2875_v29  ;;  %v2912_v61 = vadd.f32 %v5607_v5, %v2873_v32  ;;  %v2876_v46 = vadd.f32 %v4040_v54, %v2664_v21  ;;  %v4009_v51 = vpop.f32.mrf.mxu1 }
 0x21e   : > { %v3573_v58 = vpack.c.bf16 %v3036_v43, %v3036_v43  ;;  %v3005_v19 = vsel %vm2941_vm13, %v2909_v9, %v2973_v23  ;;  %v2662_v38 = vadd.f32 %v2597_v17, %v5635_v44  ;;  %v2667_v59 = vadd.f32 %v4009_v51, %v5638_v40  ;;  %v4044_v26 = vpop.f32.mrf.mxu0 }
 0x21f   : > { %v3576_v63 = vpack.c.bf16 %v3039_v53, %v3039_v53  ;;  %v3037_v16 = vmul.f32 1.4142135, %v3005_v19  ;;  %vm2946_vm14 = vcmp.ge.f32.partialorder %v2914_v7, 0.0  ;;  %v2978_v13 = vmul.f32 0.2, %v2914_v7  ;;  %v2610_v14 = vpop.f32.mrf.mxu1 }
 0x220   : > { %3197 = vst.msk [vmem:[%s5664_s6 + $0x40] sm:$0xf] %vm3180_vm8, %v3573_v58  ;;  %vm2944_vm15 = vcmp.ge.f32.partialorder %v2912_v61, 0.0  ;;  %v2976_v28 = vmul.f32 0.2, %v2912_v61  ;;  %v2915_v10 = vadd.f32 %v5607_v5, %v2876_v46  ;;  %v2874_v35 = vadd.f32 %v2809_v22, %v2662_v38  ;;  %v2825_v34 = vpop.f32.mrf.mxu0 }
 0x221   : > { %3200 = vst.msk [vmem:[%s5664_s6 + $0x4c] sm:$0xf] %vm3180_vm8, %v3576_v63  ;;  %v3574_v44 = vpack.c.bf16 %v3037_v16, %v3037_v16  ;;  %v3010_v4 = vsel %vm2946_vm14, %v2914_v7, %v2978_v13  ;;  %v2879_v40 = vadd.f32 %v4043_v36, %v2667_v59  ;;  %v2665_v11 = vadd.f32 %v2610_v14, %v5641_v15  ;;  %v4010_v0 = vpop.f32.mrf.mxu1 }
 0x222   : > { %v3042_v62 = vmul.f32 1.4142135, %v3010_v4  ;;  %v3008_v57 = vsel %vm2944_vm15, %v2912_v61, %v2976_v28  ;;  %vm2947_vm0 = vcmp.ge.f32.partialorder %v2915_v10, 0.0  ;;  %v2979_v39 = vmul.f32 0.2, %v2915_v10  ;;  %v4047_v41 = vpop.f32.mrf.mxu0 }
 0x223   : > { %3198 = vst.msk [vmem:[%s5664_s6 + $0x44] sm:$0xf] %vm3180_vm8, %v3574_v44  ;;  %v3040_v6 = vmul.f32 1.4142135, %v3008_v57  ;;  %v2913_v54 = vadd.f32 %v5607_v5, %v2874_v35  ;;  %v2918_v56 = vadd.f32 %v5607_v5, %v2879_v40  ;;  %v2877_v27 = vadd.f32 %v2822_v48, %v2665_v11  ;;  %v2613_v42 = vpop.f32.mrf.mxu1 }
 0x224   : > { %v3579_v55 = vpack.c.bf16 %v3042_v62, %v3042_v62  ;;  %v3011_v50 = vsel %vm2947_vm0, %v2915_v10, %v2979_v39  ;;  %v2668_v15 = vadd.f32 %v4010_v0, %v5645_v33  ;;  %v2666_v18 = vadd.f32 %v2613_v42, %v5661_v31  ;;  %v2838_v3 = vpop.f32.mrf.mxu0 }
 0x225   : > { %v3577_v2 = vpack.c.bf16 %v3040_v6, %v3040_v6  ;;  %v3043_v37 = vmul.f32 1.4142135, %v3011_v50  ;;  %vm2945_vm1 = vcmp.ge.f32.partialorder %v2913_v54, 0.0  ;;  %v2977_v60 = vmul.f32 0.2, %v2913_v54  ;;  %v4013_v22 = vpop.f32.mrf.mxu1 }
 0x226   : > { %3203 = vst.msk [vmem:[%s5664_s6 + $0x58] sm:$0xf] %vm3180_vm8, %v3579_v55  ;;  %vm2950_vm2 = vcmp.ge.f32.partialorder %v2918_v56, 0.0  ;;  %v2982_v25 = vmul.f32 0.2, %v2918_v56  ;;  %v2916_v30 = vadd.f32 %v5607_v5, %v2877_v27  ;;  %v2880_v12 = vadd.f32 %v4044_v26, %v2668_v15  ;;  %v4048_v7 = vpop.f32.mrf.mxu0 }
 0x227   : > { %3201 = vst.msk [vmem:[%s5664_s6 + $0x50] sm:$0xf] %vm3180_vm8, %v3577_v2  ;;  %v3580_v45 = vpack.c.bf16 %v3043_v37, %v3043_v37  ;;  %v3009_v33 = vsel %vm2945_vm1, %v2913_v54, %v2977_v60  ;;  %v2878_v9 = vadd.f32 %v2825_v34, %v2666_v18  ;;  %v2671_v31 = vadd.f32 %v4013_v22, %v5672_v52  ;;  %v2626_v29 = vpop.f32.mrf.mxu1 }
 0x228   : > { %v3041_v36 = vmul.f32 1.4142135, %v3009_v33  ;;  %v3014_v20 = vsel %vm2950_vm2, %v2918_v56, %v2982_v25  ;;  %vm2948_vm3 = vcmp.ge.f32.partialorder %v2916_v30, 0.0  ;;  %v2980_v8 = vmul.f32 0.2, %v2916_v30  ;;  %v2841_v28 = vpop.f32.mrf.mxu0 }
 0x229   : > { %3204 = vst.msk [vmem:[%s5664_s6 + $0x5c] sm:$0xf] %vm3180_vm8, %v3580_v45  ;;  %v3046_v32 = vmul.f32 1.4142135, %v3014_v20  ;;  %v2919_v21 = vadd.f32 %v5607_v5, %v2880_v12  ;;  %v2917_v17 = vadd.f32 %v5607_v5, %v2878_v9  ;;  %v2883_v43 = vadd.f32 %v4047_v41, %v2671_v31  ;;  %v4014_v24 = vpop.f32.mrf.mxu1 }
 0x22a   : > { %v3578_v23 = vpack.c.bf16 %v3041_v36, %v3041_v36  ;;  %v3012_v48 = vsel %vm2948_vm3, %v2916_v30, %v2980_v8  ;;  %v2669_v52 = vadd.f32 %v2626_v29, %v5675_v1  ;;  %v2672_v53 = vadd.f32 %v4014_v24, %v5698_v49 }
 0x22b   : > { %v3583_v61 = vpack.c.bf16 %v3046_v32, %v3046_v32  ;;  %v3044_v46 = vmul.f32 1.4142135, %v3012_v48  ;;  %vm2951_vm4 = vcmp.ge.f32.partialorder %v2919_v21, 0.0  ;;  %v2983_v51 = vmul.f32 0.2, %v2919_v21  ;;  %v2629_v58 = vpop.f32.mrf.mxu1 }
 0x22c   : > { %3202 = vst.msk [vmem:[%s5664_s6 + $0x54] sm:$0xf] %vm3180_vm8, %v3578_v23  ;;  %vm2949_vm5 = vcmp.ge.f32.partialorder %v2917_v17, 0.0  ;;  %v2981_v19 = vmul.f32 0.2, %v2917_v17  ;;  %v2922_v38 = vadd.f32 %v5607_v5, %v2883_v43  ;;  %v2881_v59 = vadd.f32 %v2838_v3, %v2669_v52 }
 0x22d   : > { %3207 = vst.msk [vmem:[%s5664_s6 + $0x68] sm:$0xf] %vm3180_vm8, %v3583_v61  ;;  %v3581_v26 = vpack.c.bf16 %v3044_v46, %v3044_v46  ;;  %v3015_v1 = vsel %vm2951_vm4, %v2919_v21, %v2983_v51  ;;  %v2884_v63 = vadd.f32 %v4048_v7, %v2672_v53  ;;  %v2670_v49 = vadd.f32 %v2629_v58, %v5707_v47 }
 0x22e   : > { %v3047_v16 = vmul.f32 1.4142135, %v3015_v1  ;;  %v3013_v13 = vsel %vm2949_vm5, %v2917_v17, %v2981_v19  ;;  %vm2954_vm6 = vcmp.ge.f32.partialorder %v2922_v38, 0.0  ;;  %v2986_v14 = vmul.f32 0.2, %v2922_v38 }
 0x22f   : > { %3205 = vst.msk [vmem:[%s5664_s6 + $0x60] sm:$0xf] %vm3180_vm8, %v3581_v26  ;;  %v3045_v10 = vmul.f32 1.4142135, %v3013_v13  ;;  %v2920_v35 = vadd.f32 %v5607_v5, %v2881_v59  ;;  %v2923_v34 = vadd.f32 %v5607_v5, %v2884_v63  ;;  %v2882_v44 = vadd.f32 %v2841_v28, %v2670_v49 }
 0x230   : > { %v3584_v4 = vpack.c.bf16 %v3047_v16, %v3047_v16  ;;  %v3018_v40 = vsel %vm2954_vm6, %v2922_v38, %v2986_v14 }
 0x231   : > { %v3582_v11 = vpack.c.bf16 %v3045_v10, %v3045_v10  ;;  %v3050_v47 = vmul.f32 1.4142135, %v3018_v40  ;;  %vm2952_vm7 = vcmp.ge.f32.partialorder %v2920_v35, 0.0  ;;  %v2984_v0 = vmul.f32 0.2, %v2920_v35 }
 0x232   : > { %3208 = vst.msk [vmem:[%s5664_s6 + $0x6c] sm:$0xf] %vm3180_vm8, %v3584_v4  ;;  %vm2955_vm9 = vcmp.ge.f32.partialorder %v2923_v34, 0.0  ;;  %v2987_v62 = vmul.f32 0.2, %v2923_v34  ;;  %v2921_v57 = vadd.f32 %v5607_v5, %v2882_v44 }
 0x233   : > { %3206 = vst.msk [vmem:[%s5664_s6 + $0x64] sm:$0xf] %vm3180_vm8, %v3582_v11  ;;  %v3587_v39 = vpack.c.bf16 %v3050_v47, %v3050_v47  ;;  %v3016_v41 = vsel %vm2952_vm7, %v2920_v35, %v2984_v0 }
 0x234   : > { %v3048_v6 = vmul.f32 1.4142135, %v3016_v41  ;;  %v3019_v54 = vsel %vm2955_vm9, %v2923_v34, %v2987_v62  ;;  %vm2953_vm10 = vcmp.ge.f32.partialorder %v2921_v57, 0.0  ;;  %v2985_v56 = vmul.f32 0.2, %v2921_v57 }
 0x235   : > { %3211 = vst.msk [vmem:[%s5664_s6 + $0x78] sm:$0xf] %vm3180_vm8, %v3587_v39  ;;  %v3051_v27 = vmul.f32 1.4142135, %v3019_v54 }
 0x236   : > { %v3585_v42 = vpack.c.bf16 %v3048_v6, %v3048_v6  ;;  %v3017_v5 = vsel %vm2953_vm10, %v2921_v57, %v2985_v56 }
 0x237   : > { %v3588_v55 = vpack.c.bf16 %v3051_v27, %v3051_v27  ;;  %v3049_v50 = vmul.f32 1.4142135, %v3017_v5 }
 0x238   : > { %3209 = vst.msk [vmem:[%s5664_s6 + $0x70] sm:$0xf] %vm3180_vm8, %v3585_v42 }
 0x239   : > { %3212 = vst.msk [vmem:[%s5664_s6 + $0x7c] sm:$0xf] %vm3180_vm8, %v3588_v55  ;;  %v3586_v15 = vpack.c.bf16 %v3049_v50, %v3049_v50 }
 0x23b   : > { %3210 = vst.msk [vmem:[%s5664_s6 + $0x74] sm:$0xf] %vm3180_vm8, %v3586_v15 }
 0x23c   : > { %4134 = shalt.err (!%p4131_p3)
}
 0x23d   : > { %s4135_s25 = scalar_lea.hbm %s5800_s11, 2048  ;;  %s4139_s28 = scalar_lea.hbm %s5853_s3, 4096 }
 0x23e   : > { %p4136_p4 = scmp.ne.s32.totalorder %s5800_s11, %s4135_s25  ;;  %p4140_p9 = scmp.lt.s32.totalorder %s5800_s11, %s5853_s3 }
 0x23f   : > { %p4141_p10 = scmp.lt.s32.totalorder %s4139_s28, %s4135_s25 }
 0x240   : > { %p4137_p7 = pnand %p4136_p4, %p4244_p5 }
 0x241   : > { %p4142_p11 = por %p4141_p10, %p4140_p9 }
 0x242   : > { %p4138_p8 = pneg %p4137_p7 }
 0x244   : > { %p4143_p12 = pnand %p4142_p11, %p4138_p8 }
 0x246   : > { %4146 = shalt.err (!%p4143_p12)
}
 0x247   : > { %s4184_s4 = smov 64   ;;  %s4185_s5 = smov 4  }
 0x248   : > { %4062 = dma.vmem_to_hbm [thread:$0]  (%p4244_p5), %s5802_s8, 2048, %s5800_s11, %s5810_s16, %s4184_s4, %s4184_s4, %s4185_s5  }
 0x249 PF: > { %p4068_p13 = scmp.ge.s32.totalorder %s4181_s15, 2  ;;  %s3242_s6 = sand.u32 1, %s4169_s12  }
 0x24a   : > { %s3243_s7 = scalar_lea.sflag [#allocation3], %s3242_s6 }
 0x24b   : > { %p4065_p0 = pnand %p4068_p13, %p4248_p6 }
 0x24d   : > { %p4066_p1 = pneg %p4065_p0 }
 0x24f   : > { %4164 = dma.done.wait (%p4066_p1), %s3243_s7, 2048  }
 0x250   : > { %4166 = vsyncadd (%p4066_p1), %s3243_s7, 4294965248  ;;  %p13_p2 = scmp.ge.s32.totalorder %s4231_s18, 4   ;;  %s6044_s12 = smov %s4173_s13 }
 0x251   : > { %s6045_s13 = smov %s4177_s14  ;;  %s6046_s14 = smov %s4242_s21 }
 0x252   : > { %s6047_s15 = smov %s4231_s18  ;;  %15 = sbr.rel (!%p13_p2) target bundleno = 3 (0x3), region = 75 }
 0x257   :  { %3248 = vsyncpa [#allocation3], 1 }
 0x258   :  { %3250 = vsyncpa [#allocation3 + $0x1], 1 }

</bundles_post_ra>
